<compile_context>
chip_gen: v7x
topology: tpu7x:2x2x1
jax: 0.10.0
libtpu: 0.0.40
codegen_flags: <defaults>
</compile_context>

<pallas_src>
import jax
import jax.numpy as jnp
from jax.experimental import pallas as pl
from jax.experimental.pallas import tpu as pltpu


# ---------------------------------------------------------------------------
# Helpers: VMEM budgeting and batch-tile selection.
# ---------------------------------------------------------------------------
def _round_up(x, m):
    return (x + m - 1) // m * m


def _vmem_capacity_bytes():
    try:
        return int(pltpu.get_tpu_info().vmem_capacity_bytes)
    except Exception:
        return 64 * 1024 * 1024          # conservative fallback (v7x per-TC)


def _pick_batch_tile(B, budget_fn, rows_per_batch, vmem_cap, target_rows=256):
    """Smallest divisor of B whose flattened MXU M dim reaches target_rows,
    subject to: the VMEM budget fits and (when possible) >= 2 batch tiles remain
    so the parallel grid axis can still shard across v7x's two TensorCores."""
    best = 1
    for d in range(1, B + 1):
        if B % d:
            continue
        if B >= 2 and B // d < 2:        # keep >= 2 grid points for megacore
            break
        if budget_fn(d) > vmem_cap:
            break
        best = d
        if d * rows_per_batch >= target_rows:
            break
    return best


# ---------------------------------------------------------------------------
# Fused kernel: merge dropped tokens + full block stack + dropped-token epilogue.
# ---------------------------------------------------------------------------
def _stage_blocks_kernel(xk_ref, xd_ref, mw_ref, w1s_ref, b1s_ref, w2s_ref, b2s_ref,
                         xo_ref, xdo_ref, x_sc, raw_sc):
    bt, T_pad, C = x_sc.shape
    Tk = xk_ref.shape[1]                 # kept tokens (cls + top-N_)
    n_blocks = w1s_ref.shape[0]
    M = bt * T_pad

    # ---- init: kept tokens + weighted merge of dropped tokens (all f32) ----
    x_sc[...] = jnp.zeros_like(x_sc)                      # zero the padded rows
    x_sc[:, :Tk, :] = xk_ref[...].astype(jnp.float32)
    s = mw_ref[...].astype(jnp.float32)                   # (bt, Nd, 1), stays f32
    w = s / jnp.sum(s, axis=1, keepdims=True)
    x_sc[:, Tk:Tk + 1, :] = jnp.sum(w * xd_ref[...].astype(jnp.float32),
                                    axis=1, keepdims=True)
    raw_sc[...] = jnp.zeros_like(raw_sc)

    # ---- block stack: all weights resident, n_blocks static -> unrolled ----
    for k in range(n_blocks):
        # T_pad % 8 == 0 and C % 128 == 0 -> reshape is tile-aligned (no copy)
        x2d = x_sc[...].reshape(M, C)
        h = jnp.dot(x2d.astype(w1s_ref.dtype), w1s_ref[k],
                    preferred_element_type=jnp.float32) + b1s_ref[k]
        h = jax.nn.gelu(h)                                # f32 elementwise (v5e-safe)
        d = jnp.dot(h.astype(w2s_ref.dtype), w2s_ref[k],
                    preferred_element_type=jnp.float32) + b2s_ref[k]
        d3 = d.reshape(bt, T_pad, C)
        x_sc[...] = x_sc[...] + d3                        # residual add in f32
        raw_sc[...] = raw_sc[...] + d3[:, Tk:Tk + 1, :]   # raw[:, -1:] accumulator

    # ---- epilogue: kept tokens out, dropped tokens + accumulated raw ----
    xo_ref[...] = x_sc[:, :Tk, :].astype(xo_ref.dtype)
    xdo_ref[...] = (xd_ref[...].astype(jnp.float32) + raw_sc[...]).astype(xdo_ref.dtype)


def _stage_vmem_estimate(bt, Tk, Nd, C, H, T_pad, n_blocks, in_b, w_b, out_b):
    inputs = 2 * (bt * Tk * C + bt * Nd * C + bt * Nd) * in_b     # double-buffered
    weights = 2 * n_blocks * (C * H + H + H * C + C) * w_b        # resident (2x safe)
    outputs = 2 * (bt * Tk * C + bt * Nd * C) * out_b
    scratch = (bt * T_pad * C + bt * C) * 4
    return inputs + weights + outputs + scratch


def stage_blocks_pallas(x_keep, x_drop, merge_weight, w1s, b1s, w2s, b2s,
                        *, batch_tile=None, compute_dtype=jnp.bfloat16):
    """Fused merge + block stack + epilogue.

    x_keep: (B, N_+1, C)  x_drop: (B, Nd, C)  merge_weight: (B, Nd)
    w1s: (n_blocks, C, H)  b1s: (n_blocks, 1, H)  w2s: (n_blocks, H, C)  b2s: (n_blocks, 1, C)
    Returns (x_keep_out (B, N_+1, C), x_drop_out (B, Nd, C)).
    """
    B, Tk, C = x_keep.shape
    Nd = x_drop.shape[1]
    n_blocks, _, H = w1s.shape
    T = Tk + 1
    T_pad = _round_up(T, 8)
    out_dtype = x_keep.dtype

    # Only the matmul weights are cast; activations / merge path stay f32.
    if compute_dtype is not None:
        w1s = w1s.astype(compute_dtype)
        w2s = w2s.astype(compute_dtype)
    b1s = b1s.astype(jnp.float32)
    b2s = b2s.astype(jnp.float32)

    in_b = jnp.dtype(x_keep.dtype).itemsize
    w_b = jnp.dtype(w1s.dtype).itemsize
    out_b = jnp.dtype(out_dtype).itemsize
    vmem_cap = int(_vmem_capacity_bytes() * 0.8)          # generation-aware cap
    budget_fn = lambda bt: _stage_vmem_estimate(bt, Tk, Nd, C, H, T_pad,
                                                n_blocks, in_b, w_b, out_b)
    if batch_tile is None:
        batch_tile = _pick_batch_tile(B, budget_fn, T_pad, vmem_cap)
    bt = batch_tile
    assert B % bt == 0, "batch_tile must divide batch"

    budget = budget_fn(bt)
    cp_kwargs = {"dimension_semantics": ("parallel",)}
    if budget > 16 * 1024 * 1024:
        cp_kwargs["vmem_limit_bytes"] = min(max(int(budget * 1.5), 32 << 20), vmem_cap)

    mw3 = merge_weight.reshape(B, Nd, 1)

    return pl.pallas_call(
        _stage_blocks_kernel,
        out_shape=(jax.ShapeDtypeStruct((B, Tk, C), out_dtype),
                   jax.ShapeDtypeStruct((B, Nd, C), out_dtype)),
        grid=(B // bt,),
        in_specs=[
            pl.BlockSpec((bt, Tk, C), lambda b: (b, 0, 0)),
            pl.BlockSpec((bt, Nd, C), lambda b: (b, 0, 0)),
            pl.BlockSpec((bt, Nd, 1), lambda b: (b, 0, 0)),
            pl.BlockSpec((n_blocks, C, H), lambda b: (0, 0, 0)),   # resident weights
            pl.BlockSpec((n_blocks, 1, H), lambda b: (0, 0, 0)),
            pl.BlockSpec((n_blocks, H, C), lambda b: (0, 0, 0)),
            pl.BlockSpec((n_blocks, 1, C), lambda b: (0, 0, 0)),
        ],
        out_specs=(pl.BlockSpec((bt, Tk, C), lambda b: (b, 0, 0)),
                   pl.BlockSpec((bt, Nd, C), lambda b: (b, 0, 0))),
        scratch_shapes=[pltpu.VMEM((bt, T_pad, C), jnp.float32),
                        pltpu.VMEM((bt, 1, C), jnp.float32)],
        compiler_params=pltpu.CompilerParams(**cp_kwargs),
    )(x_keep, x_drop, mw3, w1s, b1s, w2s, b2s)


# ---------------------------------------------------------------------------
# prune_ratio >= 1 path: fused block stack on the full token set.
# ---------------------------------------------------------------------------
def _blocks_only_kernel(x_ref, w1s_ref, b1s_ref, w2s_ref, b2s_ref, xo_ref, x_sc):
    bt, T_pad, C = x_sc.shape
    T = x_ref.shape[1]
    n_blocks = w1s_ref.shape[0]
    M = bt * T_pad

    x_sc[...] = jnp.zeros_like(x_sc)
    x_sc[:, :T, :] = x_ref[...].astype(jnp.float32)
    for k in range(n_blocks):
        x2d = x_sc[...].reshape(M, C)
        h = jnp.dot(x2d.astype(w1s_ref.dtype), w1s_ref[k],
                    preferred_element_type=jnp.float32) + b1s_ref[k]
        h = jax.nn.gelu(h)
        d = jnp.dot(h.astype(w2s_ref.dtype), w2s_ref[k],
                    preferred_element_type=jnp.float32) + b2s_ref[k]
        x_sc[...] = x_sc[...] + d.reshape(bt, T_pad, C)
    xo_ref[...] = x_sc[:, :T, :].astype(xo_ref.dtype)


def _blocks_vmem_estimate(bt, T, C, H, T_pad, n_blocks, in_b, w_b, out_b):
    inputs = 2 * bt * T * C * in_b
    weights = 2 * n_blocks * (C * H + H + H * C + C) * w_b
    outputs = 2 * bt * T * C * out_b
    scratch = bt * T_pad * C * 4
    return inputs + weights + outputs + scratch


def run_blocks_pallas(x, w1s, b1s, w2s, b2s, *, batch_tile=None,
                      compute_dtype=jnp.bfloat16):
    B, T, C = x.shape
    n_blocks, _, H = w1s.shape
    T_pad = _round_up(T, 8)
    out_dtype = x.dtype

    if compute_dtype is not None:
        w1s = w1s.astype(compute_dtype)
        w2s = w2s.astype(compute_dtype)
    b1s = b1s.astype(jnp.float32)
    b2s = b2s.astype(jnp.float32)

    in_b = jnp.dtype(x.dtype).itemsize
    w_b = jnp.dtype(w1s.dtype).itemsize
    out_b = jnp.dtype(out_dtype).itemsize
    vmem_cap = int(_vmem_capacity_bytes() * 0.8)
    budget_fn = lambda bt: _blocks_vmem_estimate(bt, T, C, H, T_pad,
                                                 n_blocks, in_b, w_b, out_b)
    if batch_tile is None:
        batch_tile = _pick_batch_tile(B, budget_fn, T_pad, vmem_cap)
    bt = batch_tile
    assert B % bt == 0

    budget = budget_fn(bt)
    cp_kwargs = {"dimension_semantics": ("parallel",)}
    if budget > 16 * 1024 * 1024:
        cp_kwargs["vmem_limit_bytes"] = min(max(int(budget * 1.5), 32 << 20), vmem_cap)

    return pl.pallas_call(
        _blocks_only_kernel,
        out_shape=jax.ShapeDtypeStruct((B, T, C), out_dtype),
        grid=(B // bt,),
        in_specs=[
            pl.BlockSpec((bt, T, C), lambda b: (b, 0, 0)),
            pl.BlockSpec((n_blocks, C, H), lambda b: (0, 0, 0)),
            pl.BlockSpec((n_blocks, 1, H), lambda b: (0, 0, 0)),
            pl.BlockSpec((n_blocks, H, C), lambda b: (0, 0, 0)),
            pl.BlockSpec((n_blocks, 1, C), lambda b: (0, 0, 0)),
        ],
        out_specs=pl.BlockSpec((bt, T, C), lambda b: (b, 0, 0)),
        scratch_shapes=[pltpu.VMEM((bt, T_pad, C), jnp.float32)],
        compiler_params=pltpu.CompilerParams(**cp_kwargs),
    )(x, w1s, b1s, w2s, b2s)


# ---------------------------------------------------------------------------
# StageModule forward: sort/gather glue in JAX, everything hot in Pallas.
# ---------------------------------------------------------------------------
def stage_module_forward(x_, global_attn, ori_indices, blocks, prune_ratio,
                         *, batch_tile=None, compute_dtype=jnp.bfloat16):
    B, Np1, C = x_.shape
    N = Np1 - 1
    w1s = jnp.stack([blk[0] for blk in blocks])
    b1s = jnp.stack([blk[1] for blk in blocks])
    w2s = jnp.stack([blk[2] for blk in blocks])
    b2s = jnp.stack([blk[3] for blk in blocks])

    if prune_ratio >= 1:
        x_out = run_blocks_pallas(x_, w1s, b1s, w2s, b2s,
                                  batch_tile=batch_tile, compute_dtype=compute_dtype)
        return x_out, global_attn, ori_indices

    N_ = int(N * prune_ratio)
    # TODO(synk): if N_ == N the dropped set is empty and the merge normalization
    #             divides by zero — identical behaviour to the PyTorch reference.

    # ---- sort tokens 1..N by global attention (argsort/gather glue in JAX) ----
    x_tok = x_[:, 1:]
    idx = jnp.argsort(-global_attn, axis=1)                        # descending
    x_sorted = jnp.take_along_axis(x_tok, idx[..., None], axis=1)
    ga_sorted = jnp.take_along_axis(global_attn, idx, axis=1)
    oi_sorted = jnp.take_along_axis(ori_indices, idx, axis=1)

    x_keep = jnp.concatenate([x_[:, :1], x_sorted[:, :N_]], axis=1)  # cls + kept
    x_drop = x_sorted[:, N_:]
    merge_w = ga_sorted[:, N_:]

    # ---- fused Pallas: merge_tokens + block stack + dropped-token epilogue ----
    x_keep_out, x_drop_out = stage_blocks_pallas(
        x_keep, x_drop, merge_w, w1s, b1s, w2s, b2s,
        batch_tile=batch_tile, compute_dtype=compute_dtype)

    # single concatenate builds the final tensor (no full-tensor .at[].set copies)
    x_out = jnp.concatenate([x_keep_out, x_drop_out], axis=1)
    return x_out, ga_sorted, oi_sorted


# ---------------------------------------------------------------------------
# Pure-JAX reference (correctness check)
# ---------------------------------------------------------------------------
def _ref_block(x, w1, b1, w2, b2):
    h = jax.nn.gelu(x @ w1 + b1)
    d = h @ w2 + b2
    return x + d, d


def stage_module_forward_ref(x_, global_attn, ori_indices, blocks, prune_ratio):
    B, Np1, C = x_.shape
    N = Np1 - 1
    if prune_ratio >= 1:
        for (w1, b1, w2, b2) in blocks:
            x_, _ = _ref_block(x_, w1, b1, w2, b2)
        return x_, global_attn, ori_indices

    N_ = int(N * prune_ratio)
    x_tok = x_[:, 1:]
    idx = jnp.argsort(-global_attn, axis=1)
    x_sorted = jnp.take_along_axis(x_tok, idx[..., None], axis=1)
    ga_sorted = jnp.take_along_axis(global_attn, idx, axis=1)
    oi_sorted = jnp.take_along_axis(ori_indices, idx, axis=1)

    x_keep = jnp.concatenate([x_[:, :1], x_sorted[:, :N_]], axis=1)
    x_drop = x_sorted[:, N_:]
    mw = ga_sorted[:, N_:]
    w = mw / jnp.sum(mw, axis=1, keepdims=True)
    add_token = jnp.sum(w[..., None] * x_drop, axis=1, keepdims=True)

    x = jnp.concatenate([x_keep, add_token], axis=1)
    raw_total = jnp.zeros((B, 1, C), x_.dtype)
    for (w1, b1, w2, b2) in blocks:
        x, raw = _ref_block(x, w1, b1, w2, b2)
        raw_total = raw_total + raw[:, -1:]
    x_drop = x_drop + raw_total
    x_out = jnp.concatenate([x[:, :-1], x_drop], axis=1)
    return x_out, ga_sorted, oi_sorted


# ---------------------------------------------------------------------------
if __name__ == "__main__":
    key = jax.random.PRNGKey(0)
    B, N, C, H = 2, 64, 128, 256        # lane-aligned C/H (multiples of 128)
    n_blocks = 3
    prune_ratio = 0.5

    keys = jax.random.split(key, 5 + 4 * n_blocks)
    x_ = jax.random.normal(keys[0], (B, N + 1, C), jnp.float32)      # cls + N tokens
    global_attn = jax.nn.softmax(
        jax.random.normal(keys[1], (B, N), jnp.float32), axis=-1)
    ori_indices = jnp.tile(jnp.arange(N, dtype=jnp.float32)[None], (B, 1))

    blocks = []
    for i in range(n_blocks):
        kk = keys[2 + 4 * i: 2 + 4 * (i + 1)]
        w1 = jax.random.normal(kk[0], (C, H), jnp.float32) * 0.05
        b1 = jax.random.normal(kk[1], (1, H), jnp.float32) * 0.01
        w2 = jax.random.normal(kk[2], (H, C), jnp.float32) * 0.05
        b2 = jax.random.normal(kk[3], (1, C), jnp.float32) * 0.01
        blocks.append((w1, b1, w2, b2))

    # ---- pruned path, f32 exactness check (compute_dtype=None keeps f32 MXU) ----
    out, ga_s, oi_s = stage_module_forward(
        x_, global_attn, ori_indices, blocks, prune_ratio, compute_dtype=None)
    out = jax.block_until_ready(out)
    ref, ga_r, oi_r = stage_module_forward_ref(
        x_, global_attn, ori_indices, blocks, prune_ratio)
    assert out.shape == (B, N + 1, C)
    assert jnp.allclose(out, ref, rtol=1e-3, atol=1e-3), "pruned path mismatch"
    assert jnp.allclose(ga_s, ga_r) and jnp.allclose(oi_s, oi_r)

    # ---- larger batch exercises auto batch_tile > 1 (bt*T_pad packs the MXU) ----
    B8 = 8
    x8 = jax.random.normal(keys[2 + 4 * n_blocks], (B8, N + 1, C), jnp.float32)
    ga8 = jax.nn.softmax(
        jax.random.normal(keys[3 + 4 * n_blocks], (B8, N), jnp.float32), axis=-1)
    oi8 = jnp.tile(jnp.arange(N, dtype=jnp.float32)[None], (B8, 1))
    out8, _, _ = stage_module_forward(x8, ga8, oi8, blocks, prune_ratio,
                                      compute_dtype=None)
    out8 = jax.block_until_ready(out8)
    ref8, _, _ = stage_module_forward_ref(x8, ga8, oi8, blocks, prune_ratio)
    assert jnp.allclose(out8, ref8, rtol=1e-3, atol=1e-3), "batch-tiled path mismatch"

    # ---- prune_ratio >= 1 path (fused block stack on full x_) ----
    out_full, _, _ = stage_module_forward(
        x_, global_attn, ori_indices, blocks, 1.0, compute_dtype=None)
    out_full = jax.block_until_ready(out_full)
    ref_full, _, _ = stage_module_forward_ref(
        x_, global_attn, ori_indices, blocks, 1.0)
    assert jnp.allclose(out_full, ref_full, rtol=1e-3, atol=1e-3), "full path mismatch"

    # ---- default bf16-weight MXU path (all gens); f32 accumulation in-kernel ----
    out_bf16, _, _ = stage_module_forward(
        x_, global_attn, ori_indices, blocks, prune_ratio)   # compute_dtype=bf16 default
    out_bf16 = jax.block_until_ready(out_bf16)
    assert out_bf16.shape == (B, N + 1, C)
    assert bool(jnp.all(jnp.isfinite(out_bf16)))
    assert float(jnp.max(jnp.abs(out_bf16 - ref))) < 0.5, "bf16 path diverged"

    print("KERNEL_OK")
</pallas_src>

<mosaic_0001>
module attributes {stable_mosaic.version = 11 : i64} {
  func.func @_stage_blocks_kernel(%arg0: i32, %arg1: memref<1x33x128xf32, #tpu.memory_space<vmem>>, %arg2: memref<1x32x128xf32, #tpu.memory_space<vmem>>, %arg3: memref<1x32x1xf32, #tpu.memory_space<vmem>>, %arg4: memref<3x128x256xf32, #tpu.memory_space<vmem>>, %arg5: memref<3x1x256xf32, #tpu.memory_space<vmem>>, %arg6: memref<3x256x128xf32, #tpu.memory_space<vmem>>, %arg7: memref<3x1x128xf32, #tpu.memory_space<vmem>>, %arg8: memref<1x33x128xf32, #tpu.memory_space<vmem>>, %arg9: memref<1x32x128xf32, #tpu.memory_space<vmem>>, %arg10: memref<1x40x128xf32, #tpu.memory_space<vmem>>, %arg11: memref<1x1x128xf32, #tpu.memory_space<vmem>>) attributes {dimension_semantics = [#tpu.dimension_semantics<parallel>], iteration_bounds = array<i64: 2>, scalar_prefetch = 0 : i64, scratch_operands = 2 : i64, tpu.core_type = #tpu.core_type<tc>, window_params = [{transform_indices = @transform_0, window_bounds = array<i64: 1, 33, 128>}, {transform_indices = @transform_1, window_bounds = array<i64: 1, 32, 128>}, {transform_indices = @transform_2, window_bounds = array<i64: 1, 32, 1>}, {pipeline_mode = #tpu.pipeline_mode<synchronous>, transform_indices = @transform_3, window_bounds = array<i64: 3, 128, 256>}, {pipeline_mode = #tpu.pipeline_mode<synchronous>, transform_indices = @transform_4, window_bounds = array<i64: 3, 1, 256>}, {pipeline_mode = #tpu.pipeline_mode<synchronous>, transform_indices = @transform_5, window_bounds = array<i64: 3, 256, 128>}, {pipeline_mode = #tpu.pipeline_mode<synchronous>, transform_indices = @transform_6, window_bounds = array<i64: 3, 1, 128>}, {transform_indices = @transform_7, window_bounds = array<i64: 1, 33, 128>}, {transform_indices = @transform_8, window_bounds = array<i64: 1, 32, 128>}]} {
    %cst = arith.constant 0.000000e+00 : f32
    %0 = vector.broadcast %cst : f32 to vector<1x40x128xf32>
    %c0 = arith.constant 0 : index
    %c0_0 = arith.constant 0 : index
    %c0_1 = arith.constant 0 : index
    %1 = vector.load %arg10[%c0, %c0_0, %c0_1] : memref<1x40x128xf32, #tpu.memory_space<vmem>>, vector<1x40x128xf32>
    tpu.vector_store %arg10[%c0, %c0_0, %c0_1], %0 {strides = array<i32>} : memref<1x40x128xf32, #tpu.memory_space<vmem>>, vector<1x40x128xf32>,
    %c0_2 = arith.constant 0 : index
    %c0_3 = arith.constant 0 : index
    %c0_4 = arith.constant 0 : index
    %2 = vector.load %arg1[%c0_2, %c0_3, %c0_4] : memref<1x33x128xf32, #tpu.memory_space<vmem>>, vector<1x33x128xf32>
    %c0_5 = arith.constant 0 : index
    %c0_6 = arith.constant 0 : index
    %c0_7 = arith.constant 0 : index
    %3 = vector.load %arg10[%c0_5, %c0_6, %c0_7] : memref<1x40x128xf32, #tpu.memory_space<vmem>>, vector<1x33x128xf32>
    tpu.vector_store %arg10[%c0_5, %c0_6, %c0_7], %2 {strides = array<i32>} : memref<1x40x128xf32, #tpu.memory_space<vmem>>, vector<1x33x128xf32>,
    %c0_8 = arith.constant 0 : index
    %c0_9 = arith.constant 0 : index
    %c0_10 = arith.constant 0 : index
    %4 = vector.load %arg3[%c0_8, %c0_9, %c0_10] : memref<1x32x1xf32, #tpu.memory_space<vmem>>, vector<1x32x1xf32>
    %cst_11 = arith.constant dense<0.000000e+00> : vector<1x1xf32>
    %5 = vector.multi_reduction <add>, %4, %cst_11 [1] : vector<1x32x1xf32> to vector<1x1xf32>
    %6 = vector.shape_cast %5 : vector<1x1xf32> to vector<1x1x1xf32>
    %7 = vector.broadcast %6 : vector<1x1x1xf32> to vector<1x32x1xf32>
    %8 = arith.divf %4, %7 : vector<1x32x1xf32>
    %c0_12 = arith.constant 0 : index
    %c0_13 = arith.constant 0 : index
    %c0_14 = arith.constant 0 : index
    %9 = vector.load %arg2[%c0_12, %c0_13, %c0_14] : memref<1x32x128xf32, #tpu.memory_space<vmem>>, vector<1x32x128xf32>
    %10 = vector.broadcast %8 : vector<1x32x1xf32> to vector<1x32x128xf32>
    %11 = arith.mulf %10, %9 : vector<1x32x128xf32>
    %cst_15 = arith.constant dense<0.000000e+00> : vector<1x128xf32>
    %12 = vector.multi_reduction <add>, %11, %cst_15 [1] : vector<1x32x128xf32> to vector<1x128xf32>
    %13 = vector.shape_cast %12 : vector<1x128xf32> to vector<1x1x128xf32>
    %c0_16 = arith.constant 0 : index
    %c33 = arith.constant 33 : index
    %c0_17 = arith.constant 0 : index
    %14 = vector.load %arg10[%c0_16, %c33, %c0_17] : memref<1x40x128xf32, #tpu.memory_space<vmem>>, vector<1x1x128xf32>
    tpu.vector_store %arg10[%c0_16, %c33, %c0_17], %13 {strides = array<i32>} : memref<1x40x128xf32, #tpu.memory_space<vmem>>, vector<1x1x128xf32>,
    %cst_18 = arith.constant 0.000000e+00 : f32
    %15 = vector.broadcast %cst_18 : f32 to vector<1x1x128xf32>
    %c0_19 = arith.constant 0 : index
    %c0_20 = arith.constant 0 : index
    %c0_21 = arith.constant 0 : index
    %16 = vector.load %arg11[%c0_19, %c0_20, %c0_21] : memref<1x1x128xf32, #tpu.memory_space<vmem>>, vector<1x1x128xf32>
    tpu.vector_store %arg11[%c0_19, %c0_20, %c0_21], %15 {strides = array<i32>} : memref<1x1x128xf32, #tpu.memory_space<vmem>>, vector<1x1x128xf32>,
    %c0_22 = arith.constant 0 : index
    %c0_23 = arith.constant 0 : index
    %c0_24 = arith.constant 0 : index
    %17 = vector.load %arg10[%c0_22, %c0_23, %c0_24] : memref<1x40x128xf32, #tpu.memory_space<vmem>>, vector<1x40x128xf32>
    %18 = vector.shape_cast %17 : vector<1x40x128xf32> to vector<40x128xf32>
    %c0_25 = arith.constant 0 : index
    %c0_26 = arith.constant 0 : index
    %c0_27 = arith.constant 0 : index
    %19 = vector.load %arg4[%c0_25, %c0_26, %c0_27] : memref<3x128x256xf32, #tpu.memory_space<vmem>>, vector<1x128x256xf32>
    %20 = vector.shape_cast %19 : vector<1x128x256xf32> to vector<128x256xf32>
    %cst_28 = arith.constant dense<0.000000e+00> : vector<40x256xf32>
    %21 = tpu.matmul %18, %20, %cst_28 {dimension_numbers = #tpu.dot_dimension_numbers<[1], [0], [0], [1], [0, 0, 1, 1], [], []>} : vector<40x128xf32>, vector<128x256xf32>, vector<40x256xf32> -> vector<40x256xf32>
    %c0_29 = arith.constant 0 : index
    %c0_30 = arith.constant 0 : index
    %c0_31 = arith.constant 0 : index
    %22 = vector.load %arg5[%c0_29, %c0_30, %c0_31] : memref<3x1x256xf32, #tpu.memory_space<vmem>>, vector<1x1x256xf32>
    %23 = vector.shape_cast %22 : vector<1x1x256xf32> to vector<1x256xf32>
    %24 = vector.broadcast %23 : vector<1x256xf32> to vector<40x256xf32>
    %25 = arith.addf %21, %24 : vector<40x256xf32>
    %26 = arith.mulf %25, %25 : vector<40x256xf32>
    %27 = arith.mulf %25, %26 : vector<40x256xf32>
    %cst_32 = arith.constant 4.471500e-02 : f32
    %28 = vector.broadcast %cst_32 : f32 to vector<40x256xf32>
    %29 = arith.mulf %28, %27 : vector<40x256xf32>
    %30 = arith.addf %25, %29 : vector<40x256xf32>
    %cst_33 = arith.constant 0.797884583 : f32
    %31 = vector.broadcast %cst_33 : f32 to vector<40x256xf32>
    %32 = arith.mulf %31, %30 : vector<40x256xf32>
    %33 = math.tanh %32 : vector<40x256xf32>
    %cst_34 = arith.constant 1.000000e+00 : f32
    %34 = vector.broadcast %cst_34 : f32 to vector<40x256xf32>
    %35 = arith.addf %34, %33 : vector<40x256xf32>
    %cst_35 = arith.constant 5.000000e-01 : f32
    %36 = vector.broadcast %cst_35 : f32 to vector<40x256xf32>
    %37 = arith.mulf %36, %35 : vector<40x256xf32>
    %38 = arith.mulf %25, %37 : vector<40x256xf32>
    %c0_36 = arith.constant 0 : index
    %c0_37 = arith.constant 0 : index
    %c0_38 = arith.constant 0 : index
    %39 = vector.load %arg6[%c0_36, %c0_37, %c0_38] : memref<3x256x128xf32, #tpu.memory_space<vmem>>, vector<1x256x128xf32>
    %40 = vector.shape_cast %39 : vector<1x256x128xf32> to vector<256x128xf32>
    %cst_39 = arith.constant dense<0.000000e+00> : vector<40x128xf32>
    %41 = tpu.matmul %38, %40, %cst_39 {dimension_numbers = #tpu.dot_dimension_numbers<[1], [0], [0], [1], [0, 0, 1, 1], [], []>} : vector<40x256xf32>, vector<256x128xf32>, vector<40x128xf32> -> vector<40x128xf32>
    %c0_40 = arith.constant 0 : index
    %c0_41 = arith.constant 0 : index
    %c0_42 = arith.constant 0 : index
    %42 = vector.load %arg7[%c0_40, %c0_41, %c0_42] : memref<3x1x128xf32, #tpu.memory_space<vmem>>, vector<1x1x128xf32>
    %43 = vector.shape_cast %42 : vector<1x1x128xf32> to vector<1x128xf32>
    %44 = vector.broadcast %43 : vector<1x128xf32> to vector<40x128xf32>
    %45 = arith.addf %41, %44 : vector<40x128xf32>
    %46 = vector.shape_cast %45 : vector<40x128xf32> to vector<1x40x128xf32>
    %c0_43 = arith.constant 0 : index
    %c0_44 = arith.constant 0 : index
    %c0_45 = arith.constant 0 : index
    %47 = vector.load %arg10[%c0_43, %c0_44, %c0_45] : memref<1x40x128xf32, #tpu.memory_space<vmem>>, vector<1x40x128xf32>
    %48 = arith.addf %47, %46 : vector<1x40x128xf32>
    %c0_46 = arith.constant 0 : index
    %c0_47 = arith.constant 0 : index
    %c0_48 = arith.constant 0 : index
    %49 = vector.load %arg10[%c0_46, %c0_47, %c0_48] : memref<1x40x128xf32, #tpu.memory_space<vmem>>, vector<1x40x128xf32>
    tpu.vector_store %arg10[%c0_46, %c0_47, %c0_48], %48 {strides = array<i32>} : memref<1x40x128xf32, #tpu.memory_space<vmem>>, vector<1x40x128xf32>,
    %c0_49 = arith.constant 0 : index
    %c0_50 = arith.constant 0 : index
    %c0_51 = arith.constant 0 : index
    %50 = vector.load %arg11[%c0_49, %c0_50, %c0_51] : memref<1x1x128xf32, #tpu.memory_space<vmem>>, vector<1x1x128xf32>
    %51 = vector.extract_strided_slice %46 {offsets = [0, 33, 0], sizes = [1, 1, 128], strides = [1, 1, 1]} : vector<1x40x128xf32> to vector<1x1x128xf32>
    %52 = arith.addf %50, %51 : vector<1x1x128xf32>
    %c0_52 = arith.constant 0 : index
    %c0_53 = arith.constant 0 : index
    %c0_54 = arith.constant 0 : index
    %53 = vector.load %arg11[%c0_52, %c0_53, %c0_54] : memref<1x1x128xf32, #tpu.memory_space<vmem>>, vector<1x1x128xf32>
    tpu.vector_store %arg11[%c0_52, %c0_53, %c0_54], %52 {strides = array<i32>} : memref<1x1x128xf32, #tpu.memory_space<vmem>>, vector<1x1x128xf32>,
    %c0_55 = arith.constant 0 : index
    %c0_56 = arith.constant 0 : index
    %c0_57 = arith.constant 0 : index
    %54 = vector.load %arg10[%c0_55, %c0_56, %c0_57] : memref<1x40x128xf32, #tpu.memory_space<vmem>>, vector<1x40x128xf32>
    %55 = vector.shape_cast %54 : vector<1x40x128xf32> to vector<40x128xf32>
    %c1 = arith.constant 1 : index
    %c0_58 = arith.constant 0 : index
    %c0_59 = arith.constant 0 : index
    %56 = vector.load %arg4[%c1, %c0_58, %c0_59] : memref<3x128x256xf32, #tpu.memory_space<vmem>>, vector<1x128x256xf32>
    %57 = vector.shape_cast %56 : vector<1x128x256xf32> to vector<128x256xf32>
    %cst_60 = arith.constant dense<0.000000e+00> : vector<40x256xf32>
    %58 = tpu.matmul %55, %57, %cst_60 {dimension_numbers = #tpu.dot_dimension_numbers<[1], [0], [0], [1], [0, 0, 1, 1], [], []>} : vector<40x128xf32>, vector<128x256xf32>, vector<40x256xf32> -> vector<40x256xf32>
    %c1_61 = arith.constant 1 : index
    %c0_62 = arith.constant 0 : index
    %c0_63 = arith.constant 0 : index
    %59 = vector.load %arg5[%c1_61, %c0_62, %c0_63] : memref<3x1x256xf32, #tpu.memory_space<vmem>>, vector<1x1x256xf32>
    %60 = vector.shape_cast %59 : vector<1x1x256xf32> to vector<1x256xf32>
    %61 = vector.broadcast %60 : vector<1x256xf32> to vector<40x256xf32>
    %62 = arith.addf %58, %61 : vector<40x256xf32>
    %63 = arith.mulf %62, %62 : vector<40x256xf32>
    %64 = arith.mulf %62, %63 : vector<40x256xf32>
    %cst_64 = arith.constant 4.471500e-02 : f32
    %65 = vector.broadcast %cst_64 : f32 to vector<40x256xf32>
    %66 = arith.mulf %65, %64 : vector<40x256xf32>
    %67 = arith.addf %62, %66 : vector<40x256xf32>
    %cst_65 = arith.constant 0.797884583 : f32
    %68 = vector.broadcast %cst_65 : f32 to vector<40x256xf32>
    %69 = arith.mulf %68, %67 : vector<40x256xf32>
    %70 = math.tanh %69 : vector<40x256xf32>
    %cst_66 = arith.constant 1.000000e+00 : f32
    %71 = vector.broadcast %cst_66 : f32 to vector<40x256xf32>
    %72 = arith.addf %71, %70 : vector<40x256xf32>
    %cst_67 = arith.constant 5.000000e-01 : f32
    %73 = vector.broadcast %cst_67 : f32 to vector<40x256xf32>
    %74 = arith.mulf %73, %72 : vector<40x256xf32>
    %75 = arith.mulf %62, %74 : vector<40x256xf32>
    %c1_68 = arith.constant 1 : index
    %c0_69 = arith.constant 0 : index
    %c0_70 = arith.constant 0 : index
    %76 = vector.load %arg6[%c1_68, %c0_69, %c0_70] : memref<3x256x128xf32, #tpu.memory_space<vmem>>, vector<1x256x128xf32>
    %77 = vector.shape_cast %76 : vector<1x256x128xf32> to vector<256x128xf32>
    %cst_71 = arith.constant dense<0.000000e+00> : vector<40x128xf32>
    %78 = tpu.matmul %75, %77, %cst_71 {dimension_numbers = #tpu.dot_dimension_numbers<[1], [0], [0], [1], [0, 0, 1, 1], [], []>} : vector<40x256xf32>, vector<256x128xf32>, vector<40x128xf32> -> vector<40x128xf32>
    %c1_72 = arith.constant 1 : index
    %c0_73 = arith.constant 0 : index
    %c0_74 = arith.constant 0 : index
    %79 = vector.load %arg7[%c1_72, %c0_73, %c0_74] : memref<3x1x128xf32, #tpu.memory_space<vmem>>, vector<1x1x128xf32>
    %80 = vector.shape_cast %79 : vector<1x1x128xf32> to vector<1x128xf32>
    %81 = vector.broadcast %80 : vector<1x128xf32> to vector<40x128xf32>
    %82 = arith.addf %78, %81 : vector<40x128xf32>
    %83 = vector.shape_cast %82 : vector<40x128xf32> to vector<1x40x128xf32>
    %c0_75 = arith.constant 0 : index
    %c0_76 = arith.constant 0 : index
    %c0_77 = arith.constant 0 : index
    %84 = vector.load %arg10[%c0_75, %c0_76, %c0_77] : memref<1x40x128xf32, #tpu.memory_space<vmem>>, vector<1x40x128xf32>
    %85 = arith.addf %84, %83 : vector<1x40x128xf32>
    %c0_78 = arith.constant 0 : index
    %c0_79 = arith.constant 0 : index
    %c0_80 = arith.constant 0 : index
    %86 = vector.load %arg10[%c0_78, %c0_79, %c0_80] : memref<1x40x128xf32, #tpu.memory_space<vmem>>, vector<1x40x128xf32>
    tpu.vector_store %arg10[%c0_78, %c0_79, %c0_80], %85 {strides = array<i32>} : memref<1x40x128xf32, #tpu.memory_space<vmem>>, vector<1x40x128xf32>,
    %c0_81 = arith.constant 0 : index
    %c0_82 = arith.constant 0 : index
    %c0_83 = arith.constant 0 : index
    %87 = vector.load %arg11[%c0_81, %c0_82, %c0_83] : memref<1x1x128xf32, #tpu.memory_space<vmem>>, vector<1x1x128xf32>
    %88 = vector.extract_strided_slice %83 {offsets = [0, 33, 0], sizes = [1, 1, 128], strides = [1, 1, 1]} : vector<1x40x128xf32> to vector<1x1x128xf32>
    %89 = arith.addf %87, %88 : vector<1x1x128xf32>
    %c0_84 = arith.constant 0 : index
    %c0_85 = arith.constant 0 : index
    %c0_86 = arith.constant 0 : index
    %90 = vector.load %arg11[%c0_84, %c0_85, %c0_86] : memref<1x1x128xf32, #tpu.memory_space<vmem>>, vector<1x1x128xf32>
    tpu.vector_store %arg11[%c0_84, %c0_85, %c0_86], %89 {strides = array<i32>} : memref<1x1x128xf32, #tpu.memory_space<vmem>>, vector<1x1x128xf32>,
    %c0_87 = arith.constant 0 : index
    %c0_88 = arith.constant 0 : index
    %c0_89 = arith.constant 0 : index
    %91 = vector.load %arg10[%c0_87, %c0_88, %c0_89] : memref<1x40x128xf32, #tpu.memory_space<vmem>>, vector<1x40x128xf32>
    %92 = vector.shape_cast %91 : vector<1x40x128xf32> to vector<40x128xf32>
    %c2 = arith.constant 2 : index
    %c0_90 = arith.constant 0 : index
    %c0_91 = arith.constant 0 : index
    %93 = vector.load %arg4[%c2, %c0_90, %c0_91] : memref<3x128x256xf32, #tpu.memory_space<vmem>>, vector<1x128x256xf32>
    %94 = vector.shape_cast %93 : vector<1x128x256xf32> to vector<128x256xf32>
    %cst_92 = arith.constant dense<0.000000e+00> : vector<40x256xf32>
    %95 = tpu.matmul %92, %94, %cst_92 {dimension_numbers = #tpu.dot_dimension_numbers<[1], [0], [0], [1], [0, 0, 1, 1], [], []>} : vector<40x128xf32>, vector<128x256xf32>, vector<40x256xf32> -> vector<40x256xf32>
    %c2_93 = arith.constant 2 : index
    %c0_94 = arith.constant 0 : index
    %c0_95 = arith.constant 0 : index
    %96 = vector.load %arg5[%c2_93, %c0_94, %c0_95] : memref<3x1x256xf32, #tpu.memory_space<vmem>>, vector<1x1x256xf32>
    %97 = vector.shape_cast %96 : vector<1x1x256xf32> to vector<1x256xf32>
    %98 = vector.broadcast %97 : vector<1x256xf32> to vector<40x256xf32>
    %99 = arith.addf %95, %98 : vector<40x256xf32>
    %100 = arith.mulf %99, %99 : vector<40x256xf32>
    %101 = arith.mulf %99, %100 : vector<40x256xf32>
    %cst_96 = arith.constant 4.471500e-02 : f32
    %102 = vector.broadcast %cst_96 : f32 to vector<40x256xf32>
    %103 = arith.mulf %102, %101 : vector<40x256xf32>
    %104 = arith.addf %99, %103 : vector<40x256xf32>
    %cst_97 = arith.constant 0.797884583 : f32
    %105 = vector.broadcast %cst_97 : f32 to vector<40x256xf32>
    %106 = arith.mulf %105, %104 : vector<40x256xf32>
    %107 = math.tanh %106 : vector<40x256xf32>
    %cst_98 = arith.constant 1.000000e+00 : f32
    %108 = vector.broadcast %cst_98 : f32 to vector<40x256xf32>
    %109 = arith.addf %108, %107 : vector<40x256xf32>
    %cst_99 = arith.constant 5.000000e-01 : f32
    %110 = vector.broadcast %cst_99 : f32 to vector<40x256xf32>
    %111 = arith.mulf %110, %109 : vector<40x256xf32>
    %112 = arith.mulf %99, %111 : vector<40x256xf32>
    %c2_100 = arith.constant 2 : index
    %c0_101 = arith.constant 0 : index
    %c0_102 = arith.constant 0 : index
    %113 = vector.load %arg6[%c2_100, %c0_101, %c0_102] : memref<3x256x128xf32, #tpu.memory_space<vmem>>, vector<1x256x128xf32>
    %114 = vector.shape_cast %113 : vector<1x256x128xf32> to vector<256x128xf32>
    %cst_103 = arith.constant dense<0.000000e+00> : vector<40x128xf32>
    %115 = tpu.matmul %112, %114, %cst_103 {dimension_numbers = #tpu.dot_dimension_numbers<[1], [0], [0], [1], [0, 0, 1, 1], [], []>} : vector<40x256xf32>, vector<256x128xf32>, vector<40x128xf32> -> vector<40x128xf32>
    %c2_104 = arith.constant 2 : index
    %c0_105 = arith.constant 0 : index
    %c0_106 = arith.constant 0 : index
    %116 = vector.load %arg7[%c2_104, %c0_105, %c0_106] : memref<3x1x128xf32, #tpu.memory_space<vmem>>, vector<1x1x128xf32>
    %117 = vector.shape_cast %116 : vector<1x1x128xf32> to vector<1x128xf32>
    %118 = vector.broadcast %117 : vector<1x128xf32> to vector<40x128xf32>
    %119 = arith.addf %115, %118 : vector<40x128xf32>
    %120 = vector.shape_cast %119 : vector<40x128xf32> to vector<1x40x128xf32>
    %c0_107 = arith.constant 0 : index
    %c0_108 = arith.constant 0 : index
    %c0_109 = arith.constant 0 : index
    %121 = vector.load %arg10[%c0_107, %c0_108, %c0_109] : memref<1x40x128xf32, #tpu.memory_space<vmem>>, vector<1x40x128xf32>
    %122 = arith.addf %121, %120 : vector<1x40x128xf32>
    %c0_110 = arith.constant 0 : index
    %c0_111 = arith.constant 0 : index
    %c0_112 = arith.constant 0 : index
    %123 = vector.load %arg10[%c0_110, %c0_111, %c0_112] : memref<1x40x128xf32, #tpu.memory_space<vmem>>, vector<1x40x128xf32>
    tpu.vector_store %arg10[%c0_110, %c0_111, %c0_112], %122 {strides = array<i32>} : memref<1x40x128xf32, #tpu.memory_space<vmem>>, vector<1x40x128xf32>,
    %c0_113 = arith.constant 0 : index
    %c0_114 = arith.constant 0 : index
    %c0_115 = arith.constant 0 : index
    %124 = vector.load %arg11[%c0_113, %c0_114, %c0_115] : memref<1x1x128xf32, #tpu.memory_space<vmem>>, vector<1x1x128xf32>
    %125 = vector.extract_strided_slice %120 {offsets = [0, 33, 0], sizes = [1, 1, 128], strides = [1, 1, 1]} : vector<1x40x128xf32> to vector<1x1x128xf32>
    %126 = arith.addf %124, %125 : vector<1x1x128xf32>
    %c0_116 = arith.constant 0 : index
    %c0_117 = arith.constant 0 : index
    %c0_118 = arith.constant 0 : index
    %127 = vector.load %arg11[%c0_116, %c0_117, %c0_118] : memref<1x1x128xf32, #tpu.memory_space<vmem>>, vector<1x1x128xf32>
    tpu.vector_store %arg11[%c0_116, %c0_117, %c0_118], %126 {strides = array<i32>} : memref<1x1x128xf32, #tpu.memory_space<vmem>>, vector<1x1x128xf32>,
    %c0_119 = arith.constant 0 : index
    %c0_120 = arith.constant 0 : index
    %c0_121 = arith.constant 0 : index
    %128 = vector.load %arg10[%c0_119, %c0_120, %c0_121] : memref<1x40x128xf32, #tpu.memory_space<vmem>>, vector<1x33x128xf32>
    %c0_122 = arith.constant 0 : index
    %c0_123 = arith.constant 0 : index
    %c0_124 = arith.constant 0 : index
    %129 = vector.load %arg8[%c0_122, %c0_123, %c0_124] : memref<1x33x128xf32, #tpu.memory_space<vmem>>, vector<1x33x128xf32>
    tpu.vector_store %arg8[%c0_122, %c0_123, %c0_124], %128 {strides = array<i32>} : memref<1x33x128xf32, #tpu.memory_space<vmem>>, vector<1x33x128xf32>,
    %c0_125 = arith.constant 0 : index
    %c0_126 = arith.constant 0 : index
    %c0_127 = arith.constant 0 : index
    %130 = vector.load %arg2[%c0_125, %c0_126, %c0_127] : memref<1x32x128xf32, #tpu.memory_space<vmem>>, vector<1x32x128xf32>
    %c0_128 = arith.constant 0 : index
    %c0_129 = arith.constant 0 : index
    %c0_130 = arith.constant 0 : index
    %131 = vector.load %arg11[%c0_128, %c0_129, %c0_130] : memref<1x1x128xf32, #tpu.memory_space<vmem>>, vector<1x1x128xf32>
    %132 = vector.broadcast %131 : vector<1x1x128xf32> to vector<1x32x128xf32>
    %133 = arith.addf %130, %132 : vector<1x32x128xf32>
    %c0_131 = arith.constant 0 : index
    %c0_132 = arith.constant 0 : index
    %c0_133 = arith.constant 0 : index
    %134 = vector.load %arg9[%c0_131, %c0_132, %c0_133] : memref<1x32x128xf32, #tpu.memory_space<vmem>>, vector<1x32x128xf32>
    tpu.vector_store %arg9[%c0_131, %c0_132, %c0_133], %133 {strides = array<i32>} : memref<1x32x128xf32, #tpu.memory_space<vmem>>, vector<1x32x128xf32>,
    return
  }
  func.func @transform_0(%arg0: i32) -> (i32, i32, i32) {
    %c0_i32 = arith.constant 0 : i32
    %c0_i32_0 = arith.constant 0 : i32
    %c0_i32_1 = arith.constant 0 : i32
    return %arg0, %c0_i32, %c0_i32_0 : i32, i32, i32
  }
  func.func @transform_1(%arg0: i32) -> (i32, i32, i32) {
    %c0_i32 = arith.constant 0 : i32
    %c0_i32_0 = arith.constant 0 : i32
    %c0_i32_1 = arith.constant 0 : i32
    return %arg0, %c0_i32, %c0_i32_0 : i32, i32, i32
  }
  func.func @transform_2(%arg0: i32) -> (i32, i32, i32) {
    %c0_i32 = arith.constant 0 : i32
    %c0_i32_0 = arith.constant 0 : i32
    %c0_i32_1 = arith.constant 0 : i32
    return %arg0, %c0_i32, %c0_i32_0 : i32, i32, i32
  }
  func.func @transform_3(%arg0: i32) -> (i32, i32, i32) {
    %c0_i32 = arith.constant 0 : i32
    %c0_i32_0 = arith.constant 0 : i32
    %c0_i32_1 = arith.constant 0 : i32
    %c0_i32_2 = arith.constant 0 : i32
    return %c0_i32, %c0_i32_0, %c0_i32_1 : i32, i32, i32
  }
  func.func @transform_4(%arg0: i32) -> (i32, i32, i32) {
    %c0_i32 = arith.constant 0 : i32
    %c0_i32_0 = arith.constant 0 : i32
    %c0_i32_1 = arith.constant 0 : i32
    %c0_i32_2 = arith.constant 0 : i32
    return %c0_i32, %c0_i32_0, %c0_i32_1 : i32, i32, i32
  }
  func.func @transform_5(%arg0: i32) -> (i32, i32, i32) {
    %c0_i32 = arith.constant 0 : i32
    %c0_i32_0 = arith.constant 0 : i32
    %c0_i32_1 = arith.constant 0 : i32
    %c0_i32_2 = arith.constant 0 : i32
    return %c0_i32, %c0_i32_0, %c0_i32_1 : i32, i32, i32
  }
  func.func @transform_6(%arg0: i32) -> (i32, i32, i32) {
    %c0_i32 = arith.constant 0 : i32
    %c0_i32_0 = arith.constant 0 : i32
    %c0_i32_1 = arith.constant 0 : i32
    %c0_i32_2 = arith.constant 0 : i32
    return %c0_i32, %c0_i32_0, %c0_i32_1 : i32, i32, i32
  }
  func.func @transform_7(%arg0: i32) -> (i32, i32, i32) {
    %c0_i32 = arith.constant 0 : i32
    %c0_i32_0 = arith.constant 0 : i32
    %c0_i32_1 = arith.constant 0 : i32
    return %arg0, %c0_i32, %c0_i32_0 : i32, i32, i32
  }
  func.func @transform_8(%arg0: i32) -> (i32, i32, i32) {
    %c0_i32 = arith.constant 0 : i32
    %c0_i32_0 = arith.constant 0 : i32
    %c0_i32_1 = arith.constant 0 : i32
    return %arg0, %c0_i32, %c0_i32_0 : i32, i32, i32
  }
}

</mosaic_0001>

<bundles_post_ra>
// kernel: tpu_custom_call.1
= control target key start
LH: loop header
LB: loop body
LE: loop exit
PB: predicated region body
PF: predicated region fallthrough
CT: control target
= control target key end

     0   :  { %14 = vsyncpa [#allocation5], 0  ;;  %s3093_s0 = inlined_call_operand.vmem [shape: f32[2,33,128], index: 0, kind: input, shape index: {}]   ;;  %s3094_s1 = inlined_call_operand.vmem [shape: f32[2,32,128], index: 1, kind: input, shape index: {}]   ;;  %s3095_s2 = inlined_call_operand.vmem [shape: f32[2,32,1], index: 2, kind: input, shape index: {}]   ;;  %s3096_s3 = inlined_call_operand.hbm [shape: f32[3,128,256], index: 3, kind: input, shape index: {}]   ;;  %s3097_s4 = inlined_call_operand.vmem [shape: f32[3,1,256], index: 4, kind: input, shape index: {}]   ;;  %s3098_s5 = inlined_call_operand.hbm [shape: f32[3,256,128], index: 5, kind: input, shape index: {}]   ;;  %s3099_s6 = inlined_call_operand.vmem [shape: f32[3,1,128], index: 6, kind: input, shape index: {}]   ;;  %s3100_s7 = inlined_call_operand.vmem [shape: f32[2,33,128], index: 7, kind: output, shape index: {0}]   ;;  %s3101_s8 = inlined_call_operand.hbm [shape: f32[2,32,128], index: 8, kind: output, shape index: {1}]  }
   0x1   :  { %15 = vsyncpa [#allocation8], 0 }
   0x2   :  { %16 = vsyncpa [#allocation6], 0 }
   0x3   :  { %18 = vsyncpa [#allocation6 + $0x1], 0  ;;  %s2522_s27 = smov 0   ;;  %s2524_s28 = smov 0  }
   0x4   :  { %s2526_s29 = smov 0   ;;  %s2528_s30 = smov 0  }
   0x5 LB: > { %3106 = sst [smem:[#allocation13_spill]] %s2459_s29  ;;  %s2543_s9 = sadd.s32 4294967295, %s2463_s30   ;;  %s2463_s30 = sphi %s2528_s30, %s3123_s30   ;;  %s2459_s29 = sphi %s2526_s29, %s3120_s29   ;;  %s2455_s28 = sphi %s2524_s28, %s3122_s28   ;;  %s2451_s27 = sphi %s2522_s27, %s3121_s27  }
   0x6   : > { %s1835_s10 = sadd.s32 4294967294, %s2463_s30   ;;  %s2547_s11 = sadd.s32 1, %s2463_s30  }
   0x7   : > { %s219_s12 = sadd.s32 1, %s2459_s29  ;;  %s216_s13 = ssub.s32 %s2463_s30, %s2547_s11 }
   0x8   : > { %p229_p0 = scmp.ne.s32.totalorder %s2459_s29, %s2455_s28  ;;  %p217_p1 = scmp.eq.s32.totalorder %s216_s13, 0 }
   0x9   : > { %p230_p2 = scmp.eq.s32.totalorder %s2543_s9, 1  ;;  %p235_p3 = scmp.ne.s32.totalorder %s2455_s28, %s2451_s27 }
   0xa   : > { %p236_p4 = scmp.eq.s32.totalorder %s1835_s10, 1  ;;  %p1836_p7 = scmp.ge.s32.totalorder %s2463_s30, 1 }
   0xb   : > { %s2558_s14 = scalar_select %p217_p1, %s2459_s29, %s219_s12  }
   0xc   : > { %p2560_p5 = por %p230_p2, %p229_p0  ;;  %p2564_p6 = por %p236_p4, %p235_p3 }
   0xd   : > { %3107 = sst [smem:[#allocation14_spill]] %s2558_s14  ;;  %p243_p8 = scmp.lt.s32.totalorder %s2463_s30, 3 }
   0xe   : > { %s3108_s15 = scalar_select %p2560_p5, 1, 0 }
   0xf   : > { %s3109_s16 = scalar_select %p2564_p6, 1, 0 }
  0x10   : > { %p3102_p9 = scmp.eq.s32.totalorder %s2543_s9, 0  ;;  %p2571_p10 = pnand %p1836_p7, %p243_p8 }
  0x11   : > { %s2465_s18 = smov [#allocation4]   ;;  %s2466_s21 = smov [#allocation7]  }
  0x12   : > { %s3110_s17 = scalar_select %p2571_p10, 1, 0 }
  0x13   : > { %s255_s19 = sshll.u32 %s2465_s18, 4  ;;  %p2210_p11 = pneg %p2571_p10  ;;  %s256_s19 = int_to_ptr.vmem [resolvable:$true] %s255_s19 }
  0x14   : > { %s271_s22 = sshll.u32 %s2466_s21, 4  ;;  %s2337_s25 = scalar_lea.hbm %s3096_s3, 12288  ;;  %s2583_s22 = int_to_ptr.vmem [resolvable:$true] %s271_s22 }
  0x15   : > { %p2579_p12 = pnand %p3102_p9, %p2210_p11  ;;  %p2338_p13 = scmp.ne.s32.totalorder %s3096_s3, %s2337_s25 }
  0x16   : > { %p2344_p3 = scmp.lt.u32.totalorder %s2337_s25, %s3096_s3 }
  0x17   : > { %p2339_p0 = pneg %p2579_p12 }
  0x19   : > { %p2340_p1 = pnand %p2339_p0, %p2338_p13 }
  0x1b   : > { %p2341_p2 = pneg %p2340_p1 }
  0x1d   : > { %p2346_p4 = pnand %p2344_p3, %p2341_p2 }
  0x1f   : > { %2349 = shalt.err (!%p2346_p4)
}
  0x20   : > { %s2350_s18 = scalar_lea.vmem %s256_s19, 12288  ;;  %p2358_p9 = scmp.lt.s32.totalorder %s256_s19, %s256_s19 }
  0x21   : > { %p2351_p7 = scmp.ne.s32.totalorder %s256_s19, %s2350_s18  ;;  %p2359_p6 = scmp.lt.s32.totalorder %s2350_s18, %s2350_s18 }
  0x23   : > { %p2353_p8 = pnand %p2351_p7, %p2339_p0  ;;  %p2360_p5 = por %p2359_p6, %p2358_p9 }
  0x25   : > { %p2354_p11 = pneg %p2353_p8 }
  0x27   : > { %p2361_p10 = pnand %p2360_p5, %p2354_p11 }
  0x29   : > { %2364 = shalt.err (!%p2361_p10)
}
  0x2a   : > { %s2467_s21 = smov 256   ;;  %s2468_s23 = smov 16  }
  0x2b   : > { %2213 = dma.hbm_to_vmem [thread:$0]  (!%p2579_p12), %s3096_s3, 12288, %s256_s19, [#allocation5], %s2467_s21, %s2467_s21, %s2468_s23  }
  0x2c   : > { %s2365_s12 = scalar_lea.hbm %s3098_s5, 12288 }
  0x2d   : > { %p2366_p13 = scmp.ne.s32.totalorder %s3098_s5, %s2365_s12  ;;  %p2372_p9 = scmp.lt.u32.totalorder %s2365_s12, %s3098_s5 }
  0x2f   : > { %p2368_p5 = pnand %p2366_p13, %p2339_p0 }
  0x31   : > { %p2369_p6 = pneg %p2368_p5 }
  0x33   : > { %p2374_p10 = pnand %p2372_p9, %p2369_p6 }
  0x35   : > { %2377 = shalt.err (!%p2374_p10)
}
  0x36   : > { %s2378_s19 = scalar_lea.vmem %s2583_s22, 12288  ;;  %p2386_p4 = scmp.lt.s32.totalorder %s2583_s22, %s2583_s22 }
  0x37   : > { %p2379_p1 = scmp.ne.s32.totalorder %s2583_s22, %s2378_s19  ;;  %p2387_p7 = scmp.lt.s32.totalorder %s2378_s19, %s2378_s19 }
  0x39   : > { %p2381_p2 = pnand %p2379_p1, %p2339_p0  ;;  %p2388_p8 = por %p2387_p7, %p2386_p4 }
  0x3b   : > { %p2382_p3 = pneg %p2381_p2 }
  0x3d   : > { %p2389_p11 = pnand %p2388_p8, %p2382_p3 }
  0x3f   : > { %2392 = shalt.err (!%p2389_p11)
}
  0x40   : > { %s2469_s29 = smov 128   ;;  %s2470_s14 = smov 8  }
  0x41   : > { %2216 = dma.hbm_to_vmem [thread:$0]  (!%p2579_p12), %s3098_s5, 12288, %s2583_s22, [#allocation8], %s2469_s29, %s2469_s29, %s2470_s14  }
  0x42   : > { %p3112_p13 = scmp.ne.s32.totalorder %s3110_s17, 0 }
  0x43   : > { %p3113_p0 = scmp.eq.s32.totalorder (!%p3112_p13), %s2543_s9, 0 }
  0x44   : > { %314 = sbr.rel (%p3112_p13) target bundleno = 1698 (0x6a2), region = 48 }
  0x4b   : > { %2438 = dma.done.wait (%p3113_p0), [#allocation5], 12288   ;;  %p3114_p5 = pmov %p3113_p0 }
  0x4c   : > { %p3115_p6 = pmov %p3113_p0 }
  0x4d   : > { %2440 = vsyncadd (%p3114_p5), [#allocation5], 4294955008 }
  0x4e   : > { %2442 = dma.done.wait (%p3115_p6), [#allocation8], 12288   ;;  %p3116_p9 = pmov %p3113_p0 }
  0x4f   : > { %v2471_v0 = vmov 0   ;;  %v2472_v1 = vmov 0.0   ;;  %p367_p12 = scmp.lt.s32.totalorder %s2543_s9, 1  ;;  %v470_v2 = vld [vmem:[#allocation4 + $0x8] sm:$0xff]  ;;  %v472_v3 = vld [vmem:[#allocation4 + $0x18] sm:$0xff]  ;;  %v469_v4 = vld [vmem:[#allocation4] sm:$0xff] }
  0x50   : > { %2444 = vsyncadd (%p3116_p9), [#allocation8], 4294955008  ;;  %2270 = vset.pattern.permute.xlu1 %v2471_v0  ;;  %2269 = vset.pattern.permute.xlu0 %v2471_v0  ;;  %391 = vst [vmem:[#allocation2 + $0x20] sm:$0xff] %v2472_v1  ;;  %v2007_v5 = vpack.c.bf16 %v472_v3, %v470_v2  ;;  %v471_v6 = vld [vmem:[#allocation4 + $0x10] sm:$0xff]  ;;  %v474_v7 = vld [vmem:[#allocation4 + $0x28] sm:$0xff]  ;;  %vm406_vm0 = vcmask 7168  }
  0x51   : > { %463 = vst [vmem:[#allocation3] sm:$0x1] %v2472_v1  ;;  %577 = vmatprep.mubr.f32.mxu0 %v2472_v1  ;;  %s2647_s17 = scalar_select %p367_p12, %s2543_s9, 1  ;;  %v476_v8 = vld [vmem:[#allocation4 + $0x38] sm:$0xff]  ;;  %v2009_v9 = vpack.c.bf16 %v471_v6, %v469_v4  ;;  %v473_v11 = vld [vmem:[#allocation4 + $0x20] sm:$0xff]  ;;  %v475_v12 = vld [vmem:[#allocation4 + $0x30] sm:$0xff] }
  0x52   : > { %v2011_v10 = vpack.c.bf16 %v476_v8, %v474_v7  ;;  %v478_v13 = vld [vmem:[#allocation4 + $0x48] sm:$0xff]  ;;  %2008 = vmatprep.subr.bf16.mxu0 %v2007_v5  ;;  %v480_v14 = vld [vmem:[#allocation4 + $0x58] sm:$0xff]  ;;  %v2013_v15 = vpack.c.bf16 %v475_v12, %v473_v11  ;;  %v477_v17 = vld [vmem:[#allocation4 + $0x40] sm:$0xff]  ;;  %p3117_p1 = scmp.ne.s32.totalorder %s3108_s15, 0  ;;  %s2474_s18 = smov [#allocation9]  }
  0x53   : > { %2010 = vmatpush1.bf16.msra.mxu0 %v2009_v9  ;;  %s1863_s20 = sshll.u32 %s2647_s17, 5  ;;  %v2015_v16 = vpack.c.bf16 %v480_v14, %v478_v13  ;;  %v479_v18 = vld [vmem:[#allocation4 + $0x50] sm:$0xff]  ;;  %v482_v19 = vld [vmem:[#allocation4 + $0x68] sm:$0xff]  ;;  %v484_v20 = vld [vmem:[#allocation4 + $0x78] sm:$0xff]  ;;  %s2199_s26 = smul.u32 40, %s2647_s17 }
  0x54   : > { %2012 = vmatprep.subr.bf16.mxu0 %v2011_v10  ;;  %s381_s25 = scalar_lea.vmem %s3095_s2, %s1863_s20  ;;  %v2017_v21 = vpack.c.bf16 %v479_v18, %v477_v17  ;;  %v2019_v22 = vpack.c.bf16 %v484_v20, %v482_v19  ;;  %v481_v23 = vld [vmem:[#allocation4 + $0x60] sm:$0xff]  ;;  %v483_v24 = vld [vmem:[#allocation4 + $0x70] sm:$0xff]  ;;  %v486_v25 = vld [vmem:[#allocation4 + $0x88] sm:$0xff]  ;;  %s2705_s29 = scalar_lea.vmem %s3094_s1, %s1863_s20 }
  0x55   : > { %v488_v26 = vld [vmem:[#allocation4 + $0x98] sm:$0xff]  ;;  %v404_v29 = vld [vmem:[%s381_s25 + $0x10] sm:$0xff]  ;;  %v2660_v30 = vld [vmem:[%s381_s25 + $0x18] sm:$0xff]  ;;  %v2021_v32 = vpack.c.bf16 %v483_v24, %v481_v23  ;;  %s2672_s13 = scalar_lea.vmem %s3093_s0, %s2199_s26  ;;  %s3025_s23 = scalar_lea.vmem %s3100_s7, %s2199_s26 }
  0x56   : > { %v2656_v27 = vld [vmem:[%s381_s25] sm:$0xff]  ;;  %v2658_v28 = vld [vmem:[%s381_s25 + $0x8] sm:$0xff]  ;;  %v410_v34 = vsel %vm406_vm0, %v404_v29, 0.0  ;;  %v2023_v35 = vpack.c.bf16 %v488_v26, %v486_v25  ;;  %v490_v39 = vld [vmem:[#allocation4 + $0xa8] sm:$0xff]  ;;  %v412_v41 = vsel %vm406_vm0, %v2660_v30, 0.0  ;;  %s364_s17 = sand.u32 1, %s2455_s28  }
  0x57   : > { %2014 = vmatpush1.bf16.msra.mxu0 %v2013_v15  ;;  %v407_v31 = vsel %vm406_vm0, %v2656_v27, 0.0  ;;  %v408_v33 = vsel %vm406_vm0, %v2658_v28, 0.0  ;;  %v485_v36 = vld [vmem:[#allocation4 + $0x80] sm:$0xff]  ;;  %v487_v37 = vld [vmem:[#allocation4 + $0x90] sm:$0xff]  ;;  %v492_v40 = vld [vmem:[#allocation4 + $0xb8] sm:$0xff]  ;;  %s1843_s26 = sshll.u32 %s364_s17, 5 }
  0x58   : > { %2016 = vmatprep.subr.bf16.mxu0 %v2015_v16  ;;  %v409_v38 = vadd.f32 %v408_v33, %v407_v31  ;;  %v396_v42 = vld [vmem:[%s2672_s13 + $0x20] sm:$0x1]  ;;  %v2025_v44 = vpack.c.bf16 %v487_v37, %v485_v36  ;;  %v2027_v45 = vpack.c.bf16 %v492_v40, %v490_v39  ;;  %v489_v46 = vld [vmem:[#allocation4 + $0xa0] sm:$0xff]  ;;  %v494_v49 = vld [vmem:[#allocation4 + $0xc8] sm:$0xff]  ;;  %s1865_s20 = sshll.u32 %s2543_s9, 9  ;;  %s366_s22 = scalar_lea.vmem [#allocation9], %s1843_s26 }
  0x59   : > { %401 = vst [vmem:[#allocation2 + $0x20] sm:$0x1] %v396_v42  ;;  %v491_v47 = vld [vmem:[#allocation4 + $0xb0] sm:$0xff]  ;;  %v496_v50 = vld [vmem:[#allocation4 + $0xd8] sm:$0xff]  ;;  %v493_v54 = vld [vmem:[#allocation4 + $0xc0] sm:$0xff]  ;;  %s1702_s24 = sshll.u32 %s366_s22, 4  ;;  %s3044_s12 = scalar_lea.hbm %s3101_s8, %s1865_s20  ;;  %s3046_s24 = int_to_ptr.vmem [resolvable:$true] %s1702_s24 }
  0x5a   : > { %v411_v43 = vadd.f32 %v410_v34, %v409_v38  ;;  %v2029_v52 = vpack.c.bf16 %v491_v47, %v489_v46  ;;  %v2031_v53 = vpack.c.bf16 %v496_v50, %v494_v49  ;;  %v495_v55 = vld [vmem:[#allocation4 + $0xd0] sm:$0xff]  ;;  %v498_v57 = vld [vmem:[#allocation4 + $0xe8] sm:$0xff]  ;;  %v500_v58 = vld [vmem:[#allocation4 + $0xf8] sm:$0xff]  ;;  %s3052_s9 = scalar_lea.sflag [#allocation6], %s364_s17  ;;  %s2397_s19 = sshll.u32 %s2474_s18, 4  ;;  %s2398_s19 = int_to_ptr.vmem [resolvable:$false] %s2397_s19 }
  0x5b   : > { %2018 = vmatpush1.bf16.msra.mxu0 %v2017_v21  ;;  %v2033_v60 = vpack.c.bf16 %v495_v55, %v493_v54  ;;  %v2035_v61 = vpack.c.bf16 %v500_v58, %v498_v57  ;;  %v497_v62 = vld [vmem:[#allocation4 + $0xe0] sm:$0xff]  ;;  %v499_v63 = vld [vmem:[#allocation4 + $0xf0] sm:$0xff]  ;;  %v715_v15 = vld [vmem:[#allocation7 + $0x88] sm:$0xff]  ;;  %s2399_s14 = scalar_lea.vmem %s2398_s19, 1024  ;;  %p2400_p4 = scmp.lt.s32.totalorder %s3046_s24, %s2398_s19 }
  0x5c   : > { %2020 = vmatprep.subr.bf16.mxu0 %v2019_v22  ;;  %v413_v48 = vadd.f32 %v412_v41, %v411_v43  ;;  %v2037_v3 = vpack.c.bf16 %v499_v63, %v497_v62  ;;  %v2678_v5 = vld [vmem:[%s2672_s13] sm:$0xff]  ;;  %v2682_v6 = vld [vmem:[%s2672_s13 + $0x8] sm:$0xff]  ;;  %v2687_v7 = vld [vmem:[%s2672_s13 + $0x10] sm:$0xff] }
  0x5d   : > { %v2693_v11 = vld [vmem:[%s2672_s13 + $0x18] sm:$0xff]  ;;  %v714_v14 = vld [vmem:[#allocation7 + $0x80] sm:$0xff]  ;;  %v717_v21 = vld [vmem:[#allocation7 + $0x98] sm:$0xff]  ;;  %s2393_s13 = scalar_lea.vmem %s3046_s24, 512 }
  0x5e   : > { %v414_v51 = vrot.slane %v413_v48, 4  ;;  %v2039_v16 = vpack.c.bf16 %v715_v15, %v714_v14  ;;  %v698_v17 = vld [vmem:[#allocation7] sm:$0xff]  ;;  %v699_v18 = vld [vmem:[#allocation7 + $0x8] sm:$0xff]  ;;  %v716_v20 = vld [vmem:[#allocation7 + $0x90] sm:$0xff]  ;;  %p2394_p10 = scmp.ne.s32.totalorder %s3046_s24, %s2393_s13  ;;  %p2401_p7 = scmp.lt.s32.totalorder %s2399_s14, %s2393_s13 }
  0x5f   : > { %2022 = vmatpush1.bf16.msra.mxu0 %v2021_v32  ;;  %v2041_v19 = vpack.c.bf16 %v699_v18, %v698_v17  ;;  %v2043_v22 = vpack.c.bf16 %v717_v21, %v716_v20  ;;  %v700_v23 = vld [vmem:[#allocation7 + $0x10] sm:$0xff]  ;;  %v701_v24 = vld [vmem:[#allocation7 + $0x18] sm:$0xff]  ;;  %v718_v26 = vld [vmem:[#allocation7 + $0xa0] sm:$0xff] }
  0x60   : > { %2024 = vmatprep.subr.bf16.mxu0 %v2023_v35  ;;  %v415_v56 = vadd.f32 %v414_v51, %v413_v48  ;;  %2040 = vmatprep.subr.bf16.mxu1 %v2039_v16  ;;  %v2045_v25 = vpack.c.bf16 %v701_v24, %v700_v23  ;;  %v720_v32 = vld [vmem:[#allocation7 + $0xb0] sm:$0xff]  ;;  %v721_v33 = vld [vmem:[#allocation7 + $0xb8] sm:$0xff]  ;;  %v722_v38 = vld [vmem:[#allocation7 + $0xc0] sm:$0xff]  ;;  %p2395_p2 = pnand %p2394_p10, %p3117_p1  ;;  %p2402_p8 = por %p2401_p7, %p2400_p4 }
  0x61   : > { %2042 = vmatpush3.bf16.msra.mxu1 %v2041_v19  ;;  %v2051_v34 = vpack.c.bf16 %v721_v33, %v720_v32  ;;  %v704_v35 = vld [vmem:[#allocation7 + $0x30] sm:$0xff]  ;;  %v705_v36 = vld [vmem:[#allocation7 + $0x38] sm:$0xff]  ;;  %v723_v39 = vld [vmem:[#allocation7 + $0xc8] sm:$0xff] }
  0x62   : > { %v416_v59 = vrot.slane %v415_v56, 2  ;;  %2044 = vmatprep.subr.bf16.mxu1 %v2043_v22  ;;  %v2053_v37 = vpack.c.bf16 %v705_v36, %v704_v35  ;;  %v706_v40 = vld [vmem:[#allocation7 + $0x40] sm:$0xff]  ;;  %v2055_v41 = vpack.c.bf16 %v723_v39, %v722_v38  ;;  %v707_v42 = vld [vmem:[#allocation7 + $0x48] sm:$0xff]  ;;  %v724_v43 = vld [vmem:[#allocation7 + $0xd0] sm:$0xff]  ;;  %p2396_p3 = pneg %p2395_p2 }
  0x63   : > { %2026 = vmatpush1.bf16.msra.mxu0 %v2025_v44  ;;  %v725_v44 = vld [vmem:[#allocation7 + $0xd8] sm:$0xff]  ;;  %v708_v47 = vld [vmem:[#allocation7 + $0x50] sm:$0xff]  ;;  %v726_v49 = vld [vmem:[#allocation7 + $0xe0] sm:$0xff] }
  0x64   : > { %2028 = vmatprep.subr.bf16.mxu0 %v2027_v45  ;;  %v417_v0 = vadd.f32 %v416_v59, %v415_v56  ;;  %v2057_v45 = vpack.c.bf16 %v707_v42, %v706_v40  ;;  %v2059_v46 = vpack.c.bf16 %v725_v44, %v724_v43  ;;  %v709_v48 = vld [vmem:[#allocation7 + $0x58] sm:$0xff]  ;;  %v727_v50 = vld [vmem:[#allocation7 + $0xe8] sm:$0xff]  ;;  %v728_v55 = vld [vmem:[#allocation7 + $0xf0] sm:$0xff]  ;;  %p2403_p11 = pnand %p2402_p8, %p2396_p3 }
  0x65   : > { %2046 = vmatpush3.bf16.msra.mxu1 %v2045_v25  ;;  %v2061_v51 = vpack.c.bf16 %v709_v48, %v708_v47  ;;  %v711_v54 = vld [vmem:[#allocation7 + $0x68] sm:$0xff]  ;;  %v729_v56 = vld [vmem:[#allocation7 + $0xf8] sm:$0xff]  ;;  %v712_v59 = vld [vmem:[#allocation7 + $0x70] sm:$0xff]  ;;  %v503_v25 = vlaneseq }
  0x66   : > { %v418_v2 = vrot.slane %v417_v0, 1  ;;  %v2067_v58 = vpack.c.bf16 %v729_v56, %v728_v55 }
  0x67   : > { %2030 = vmatpush1.bf16.msra.mxu0 %v2029_v52  ;;  %v2063_v52 = vpack.c.bf16 %v727_v50, %v726_v49 }
  0x68   : > { %2032 = vmatprep.subr.bf16.mxu0 %v2031_v53  ;;  %v419_v4 = vadd.f32 %v418_v2, %v417_v0  ;;  %v710_v53 = vld [vmem:[#allocation7 + $0x60] sm:$0xff]  ;;  %v1661_v0 = vld [vmem:[%s2705_s29] sm:$0xff] }
  0x69   : > { %v2065_v57 = vpack.c.bf16 %v711_v54, %v710_v53  ;;  %v1662_v2 = vld [vmem:[%s2705_s29 + $0x8] sm:$0xff] }
  0x6a   : > { %2271 = vrcp.f32 %v419_v4 }
  0x6b   : > { %2034 = vmatpush1.bf16.msra.mxu0 %v2033_v60  ;;  %v713_v60 = vld [vmem:[#allocation7 + $0x78] sm:$0xff] }
  0x6c   : > { %2036 = vmatprep.subr.bf16.mxu0 %v2035_v61  ;;  %v2069_v61 = vpack.c.bf16 %v713_v60, %v712_v59 }
  0x6f   : > { %2038 = vmatpush1.bf16.msra.mxu0 %v2037_v3  ;;  %v1663_v3 = vld [vmem:[%s2705_s29 + $0x10] sm:$0xff] }
  0x72   : > { %578 = vmatmul.mubr.f32.vlgmr.msra.gmra.mrb[0].mxu0 %v2678_v5 }
  0x73   : > { %583 = vmatprep.mubr.f32.mxu0 %v2472_v1 }
  0x74   : > { %v2272_v8 = vpop.eup %2271 }
  0x75   : > { %v423_v9 = vmul.f32 %v2272_v8, %v404_v29  ;;  %v421_v10 = vmul.f32 %v2272_v8, %v2656_v27  ;;  %v424_v12 = vmul.f32 %v2272_v8, %v2660_v30  ;;  %v422_v13 = vmul.f32 %v2272_v8, %v2658_v28  ;;  %v719_v27 = vld [vmem:[#allocation7 + $0xa8] sm:$0xff]  ;;  %v702_v29 = vld [vmem:[#allocation7 + $0x20] sm:$0xff] }
  0x76   : > { %584 = vmatmul.mubr.f32.gmra.mrb[2].mxu0 %v2682_v6  ;;  %v2047_v28 = vpack.c.bf16 %v719_v27, %v718_v26  ;;  %v703_v30 = vld [vmem:[#allocation7 + $0x28] sm:$0xff]  ;;  %v2715_v26 = vshrl.u32 %v503_v25, 7 }
  0x77   : > { %589 = vmatprep.mubr.f32.mxu0 %v2472_v1  ;;  %441 = vperm.xlu1 %2270, %v423_v9   ;;  %v2049_v31 = vpack.c.bf16 %v703_v30, %v702_v29 }
  0x78   : > { %431 = vperm.xlu0 %2269, %v421_v10   ;;  %2048 = vmatprep.subr.bf16.mxu1 %v2047_v28  ;;  %v1664_v10 = vld [vmem:[%s2705_s29 + $0x18] sm:$0xff]  ;;  %v2718_v27 = vsub.s32 0, %v2715_v26  ;;  %v501_v28 = vld [vmem:[%s3097_s4] sm:$0x3]  ;;  %v2724_v29 = vsub.s32 1, %v2715_v26 }
  0x79   : > { %2050 = vmatpush3.bf16.msra.mxu1 %v2049_v31 }
  0x7a   : > { %590 = vmatmul.mubr.f32.gmra.mrb[4].mxu0 %v2687_v7  ;;  %2052 = vmatprep.subr.bf16.mxu1 %v2051_v34  ;;  %v2727_v30 = vrot.slane %v501_v28, %v2718_v27  ;;  %v2730_v31 = vrot.slane %v501_v28, %v2724_v29 }
  0x7b   : > { %595 = vmatprep.mubr.f32.mxu0 %v2472_v1  ;;  %446 = vperm.xlu1 %2270, %v424_v12  }
  0x7c   : > { %436 = vperm.xlu0 %2269, %v422_v13  }
  0x7d   : > { %2054 = vmatpush3.bf16.msra.mxu1 %v2053_v37 }
  0x7e   : > { %596 = vmatmul.mubr.f32.gmra.mrb[6].mxu0 %v2693_v11  ;;  %2056 = vmatprep.subr.bf16.mxu1 %v2055_v41 }
  0x7f   : > { %601 = vmatprep.mubr.f32.mxu0 %v2472_v1 }
  0x81   : > { %2058 = vmatpush3.bf16.msra.mxu1 %v2057_v45 }
  0x82   : > { %2060 = vmatprep.subr.bf16.mxu1 %v2059_v46 }
  0x85   : > { %2062 = vmatpush3.bf16.msra.mxu1 %v2061_v51 }
  0x86   : > { %2064 = vmatprep.subr.bf16.mxu1 %v2063_v52 }
  0x89   : > { %2066 = vmatpush3.bf16.msra.mxu1 %v2065_v57 }
  0x8a   : > { %2068 = vmatprep.subr.bf16.mxu1 %v2067_v58 }
  0x8d   : > { %2070 = vmatpush3.bf16.msra.mxu1 %v2069_v61 }
  0xf6   : > { %v442_v62 = vpop.permute.xlu1 %441 }
  0xf7   : > { %v432_v63 = vpop.permute.xlu0 %431  ;;  %v451_v13 = vmul.f32 %v1663_v3, %v442_v62 }
  0xf8   : > { %v449_v8 = vmul.f32 %v1661_v0, %v432_v63 }
  0xfa   : > { %v447_v12 = vpop.permute.xlu1 %446 }
  0xfb   : > { %v437_v4 = vpop.permute.xlu0 %436  ;;  %v452_v15 = vmul.f32 %v1664_v10, %v447_v12 }
  0xfc   : > { %v450_v9 = vmul.f32 %v1662_v2, %v437_v4 }
  0xfe   : > { %v453_v14 = vadd.f32 %v450_v9, %v449_v8 }
 0x100   : > { %v454_v16 = vadd.f32 %v453_v14, %v451_v13 }
 0x102   : > { %v455_v17 = vadd.f32 %v454_v16, %v452_v15 }
 0x104   : > { %v456_v18 = vrot.slane %v455_v17, 4 }
 0x106   : > { %v457_v19 = vadd.f32 %v456_v18, %v455_v17 }
 0x108   : > { %v458_v20 = vrot.slane %v457_v19, 2 }
 0x10a   : > { %v459_v21 = vadd.f32 %v458_v20, %v457_v19 }
 0x10c   : > { %v460_v22 = vrot.slane %v459_v21, 1 }
 0x10e   : > { %v461_v23 = vadd.f32 %v460_v22, %v459_v21 }
 0x110   : > { %462 = vst [vmem:[#allocation2 + $0x21] sm:$0x1] %v461_v23 }
 0x117   : > { %v2711_v24 = vld [vmem:[#allocation2 + $0x20] sm:$0xff] }
 0x118   : > { %602 = vmatmul.mubr.f32.gmra.mrb[8].mxu0 %v2711_v24 }
 0x119   : > { %972 = vmatprep.mubr.f32.mxu0 %v2472_v1 }
 0x145   : > { %v579_v32 = vpop.f32.mrb[0].mxu0 }
 0x146   : > { %v2733_v33 = vadd.f32 %v579_v32, %v2727_v30  ;;  %v581_v34 = vpop.f32.mrb[1].mxu0 }
 0x147   : > { %v2736_v35 = vadd.f32 %v581_v34, %v2730_v31 }
 0x148   : > { %v608_v36 = vmul.f32 %v2733_v33, %v2733_v33 }
 0x149   : > { %v609_v37 = vmul.f32 %v2736_v35, %v2736_v35  ;;  %v585_v38 = vpop.f32.mrb[2].mxu0 }
 0x14a   : > { %v618_v39 = vmul.f32 %v608_v36, %v2733_v33  ;;  %v2744_v40 = vadd.f32 %v585_v38, %v2727_v30  ;;  %v587_v41 = vpop.f32.mrb[3].mxu0 }
 0x14b   : > { %v619_v42 = vmul.f32 %v609_v37, %v2736_v35  ;;  %v2748_v43 = vadd.f32 %v587_v41, %v2730_v31 }
 0x14c   : > { %v628_v44 = vmul.f32 0.044715, %v618_v39  ;;  %v610_v45 = vmul.f32 %v2744_v40, %v2744_v40 }
 0x14d   : > { %v611_v46 = vmul.f32 %v2748_v43, %v2748_v43  ;;  %v591_v47 = vpop.f32.mrb[4].mxu0  ;;  %v629_v48 = vmul.f32 0.044715, %v619_v42 }
 0x14e   : > { %v638_v49 = vadd.f32 %v628_v44, %v2733_v33  ;;  %v620_v50 = vmul.f32 %v610_v45, %v2744_v40  ;;  %v2757_v51 = vadd.f32 %v591_v47, %v2727_v30  ;;  %v593_v52 = vpop.f32.mrb[5].mxu0 }
 0x14f   : > { %v621_v53 = vmul.f32 %v611_v46, %v2748_v43  ;;  %v2761_v54 = vadd.f32 %v593_v52, %v2730_v31  ;;  %v639_v55 = vadd.f32 %v629_v48, %v2736_v35 }
 0x150   : > { %v648_v56 = vmul.f32 0.7978846, %v638_v49  ;;  %v630_v57 = vmul.f32 0.044715, %v620_v50  ;;  %v612_v58 = vmul.f32 %v2757_v51, %v2757_v51 }
 0x151   : > { %v631_v59 = vmul.f32 0.044715, %v621_v53  ;;  %v613_v60 = vmul.f32 %v2761_v54, %v2761_v54  ;;  %v597_v61 = vpop.f32.mrb[6].mxu0  ;;  %v649_v62 = vmul.f32 0.7978846, %v639_v55 }
 0x152   : > { %v640_v63 = vadd.f32 %v630_v57, %v2744_v40  ;;  %v622_v0 = vmul.f32 %v612_v58, %v2757_v51  ;;  %v2771_v2 = vadd.f32 %v597_v61, %v2727_v30  ;;  %v599_v3 = vpop.f32.mrb[7].mxu0  ;;  %2273 = vtanh.f32 %v648_v56 }
 0x153   : > { %v641_v4 = vadd.f32 %v631_v59, %v2748_v43  ;;  %v623_v8 = vmul.f32 %v613_v60, %v2761_v54  ;;  %v2776_v9 = vadd.f32 %v599_v3, %v2730_v31  ;;  %2275 = vtanh.f32 %v649_v62 }
 0x154   : > { %v650_v10 = vmul.f32 0.7978846, %v640_v63  ;;  %v632_v12 = vmul.f32 0.044715, %v622_v0  ;;  %v614_v13 = vmul.f32 %v2771_v2, %v2771_v2 }
 0x155   : > { %v651_v14 = vmul.f32 0.7978846, %v641_v4  ;;  %v633_v15 = vmul.f32 0.044715, %v623_v8  ;;  %v615_v16 = vmul.f32 %v2776_v9, %v2776_v9 }
 0x156   : > { %v642_v17 = vadd.f32 %v632_v12, %v2757_v51  ;;  %v624_v18 = vmul.f32 %v614_v13, %v2771_v2  ;;  %2277 = vtanh.f32 %v650_v10  ;;  %v864_v12 = vld [vmem:[#allocation4 + $0x108] sm:$0xff]  ;;  %v866_v13 = vld [vmem:[#allocation4 + $0x118] sm:$0xff] }
 0x157   : > { %v643_v19 = vadd.f32 %v633_v15, %v2761_v54  ;;  %v625_v20 = vmul.f32 %v615_v16, %v2776_v9  ;;  %2279 = vtanh.f32 %v651_v14  ;;  %v863_v14 = vld [vmem:[#allocation4 + $0x100] sm:$0xff]  ;;  %v2071_v15 = vpack.c.bf16 %v866_v13, %v864_v12  ;;  %v865_v16 = vld [vmem:[#allocation4 + $0x110] sm:$0xff] }
 0x158   : > { %v652_v21 = vmul.f32 0.7978846, %v642_v17  ;;  %v634_v22 = vmul.f32 0.044715, %v624_v18  ;;  %v870_v17 = vld [vmem:[#allocation4 + $0x138] sm:$0xff]  ;;  %v2073_v18 = vpack.c.bf16 %v865_v16, %v863_v14 }
 0x159   : > { %v653_v23 = vmul.f32 0.7978846, %v643_v19  ;;  %v635_v25 = vmul.f32 0.044715, %v625_v20  ;;  %v867_v19 = vld [vmem:[#allocation4 + $0x120] sm:$0xff]  ;;  %v869_v20 = vld [vmem:[#allocation4 + $0x130] sm:$0xff]  ;;  %2072 = vmatprep.subr.bf16.mxu0 %v2071_v15 }
 0x15a   : > { %v644_v28 = vadd.f32 %v634_v22, %v2771_v2  ;;  %2281 = vtanh.f32 %v652_v21  ;;  %v872_v21 = vld [vmem:[#allocation4 + $0x148] sm:$0xff]  ;;  %v874_v22 = vld [vmem:[#allocation4 + $0x158] sm:$0xff]  ;;  %2074 = vmatpush1.bf16.msra.mxu0 %v2073_v18 }
 0x15b   : > { %v645_v32 = vadd.f32 %v635_v25, %v2776_v9  ;;  %2283 = vtanh.f32 %v653_v23  ;;  %v871_v23 = vld [vmem:[#allocation4 + $0x140] sm:$0xff]  ;;  %v873_v25 = vld [vmem:[#allocation4 + $0x150] sm:$0xff] }
 0x15c   : > { %v2274_v34 = vpop.eup %2273  ;;  %v654_v36 = vmul.f32 0.7978846, %v644_v28  ;;  %v876_v28 = vld [vmem:[#allocation4 + $0x168] sm:$0xff] }
 0x15d   : > { %v2276_v37 = vpop.eup %2275  ;;  %v655_v38 = vmul.f32 0.7978846, %v645_v32  ;;  %v668_v39 = vadd.f32 1.0, %v2274_v34  ;;  %v878_v32 = vld [vmem:[#allocation4 + $0x178] sm:$0xff]  ;;  %v2081_v34 = vpack.c.bf16 %v873_v25, %v871_v23  ;;  %v2801_v25 = vld [vmem:[%s3099_s6] ss:$0 sm:$0xff] }
 0x15e   : > { %v669_v41 = vadd.f32 1.0, %v2276_v37  ;;  %2285 = vtanh.f32 %v654_v36  ;;  %v2083_v36 = vpack.c.bf16 %v878_v32, %v876_v28  ;;  %v875_v37 = vld [vmem:[#allocation4 + $0x160] sm:$0xff] }
 0x15f   : > { %v678_v42 = vmul.f32 0.5, %v668_v39  ;;  %2287 = vtanh.f32 %v655_v38  ;;  %v877_v38 = vld [vmem:[#allocation4 + $0x170] sm:$0xff] }
 0x160   : > { %v2278_v44 = vpop.eup %2277  ;;  %v679_v45 = vmul.f32 0.5, %v669_v41  ;;  %v2085_v39 = vpack.c.bf16 %v877_v38, %v875_v37  ;;  %v880_v41 = vld [vmem:[#allocation4 + $0x188] sm:$0xff] }
 0x161   : > { %v2280_v46 = vpop.eup %2279  ;;  %v688_v47 = vmul.f32 %v678_v42, %v2733_v33  ;;  %v670_v48 = vadd.f32 1.0, %v2278_v44  ;;  %v882_v42 = vld [vmem:[#allocation4 + $0x198] sm:$0xff] }
 0x162   : > { %v689_v49 = vmul.f32 %v679_v45, %v2736_v35  ;;  %v671_v50 = vadd.f32 1.0, %v2280_v46  ;;  %v2087_v44 = vpack.c.bf16 %v882_v42, %v880_v41  ;;  %v879_v45 = vld [vmem:[#allocation4 + $0x180] sm:$0xff]  ;;  %v881_v46 = vld [vmem:[#allocation4 + $0x190] sm:$0xff] }
 0x163   : > { %v680_v52 = vmul.f32 0.5, %v670_v48  ;;  %v884_v48 = vld [vmem:[#allocation4 + $0x1a8] sm:$0xff] }
 0x164   : > { %v2282_v53 = vpop.eup %2281  ;;  %801 = vmatprep.mubr.f32.mxu1 %v689_v49  ;;  %v681_v55 = vmul.f32 0.5, %v671_v50  ;;  %v886_v49 = vld [vmem:[#allocation4 + $0x1b8] sm:$0xff] }
 0x165   : > { %v2284_v56 = vpop.eup %2283  ;;  %802 = vmatmul.mubr.f32.vlgmr.msra.gmra.mrb[0].mxu1 %v688_v47  ;;  %v690_v57 = vmul.f32 %v680_v52, %v2744_v40  ;;  %v672_v58 = vadd.f32 1.0, %v2282_v53  ;;  %v2089_v47 = vpack.c.bf16 %v881_v46, %v879_v45  ;;  %v2091_v50 = vpack.c.bf16 %v886_v49, %v884_v48  ;;  %v883_v52 = vld [vmem:[#allocation4 + $0x1a0] sm:$0xff]  ;;  %v885_v53 = vld [vmem:[#allocation4 + $0x1b0] sm:$0xff] }
 0x166   : > { %v691_v59 = vmul.f32 %v681_v55, %v2748_v43  ;;  %v673_v60 = vadd.f32 1.0, %v2284_v56  ;;  %v2093_v55 = vpack.c.bf16 %v885_v53, %v883_v52  ;;  %v888_v56 = vld [vmem:[#allocation4 + $0x1c8] sm:$0xff]  ;;  %v1110_v53 = vld [vmem:[#allocation7 + $0x180] sm:$0xff] }
 0x167   : > { %v682_v61 = vmul.f32 0.5, %v672_v58 }
 0x168   : > { %v2286_v62 = vpop.eup %2285  ;;  %806 = vmatprep.mubr.f32.mxu1 %v691_v59  ;;  %v683_v33 = vmul.f32 0.5, %v673_v60  ;;  %v887_v59 = vld [vmem:[#allocation4 + $0x1c0] sm:$0xff]  ;;  %v889_v60 = vld [vmem:[#allocation4 + $0x1d0] sm:$0xff] }
 0x169   : > { %v2288_v63 = vpop.eup %2287  ;;  %807 = vmatmul.mubr.f32.gmra.mrb[2].mxu1 %v690_v57  ;;  %v692_v35 = vmul.f32 %v682_v61, %v2757_v51  ;;  %v674_v0 = vadd.f32 1.0, %v2286_v62  ;;  %v868_v51 = vld [vmem:[#allocation4 + $0x128] sm:$0xff]  ;;  %v890_v57 = vld [vmem:[#allocation4 + $0x1d8] sm:$0xff]  ;;  %v2097_v61 = vpack.c.bf16 %v889_v60, %v887_v59  ;;  %v1112_v59 = vld [vmem:[#allocation7 + $0x190] sm:$0xff] }
 0x16a   : > { %v693_v3 = vmul.f32 %v683_v33, %v2761_v54  ;;  %v675_v4 = vadd.f32 1.0, %v2288_v63  ;;  %v2075_v54 = vpack.c.bf16 %v870_v17, %v868_v51  ;;  %v2095_v58 = vpack.c.bf16 %v890_v57, %v888_v56  ;;  %v892_v62 = vld [vmem:[#allocation4 + $0x1e8] sm:$0xff]  ;;  %v894_v33 = vld [vmem:[#allocation4 + $0x1f8] sm:$0xff]  ;;  %v1094_v57 = vld [vmem:[#allocation7 + $0x100] sm:$0xff] }
 0x16b   : > { %v684_v8 = vmul.f32 0.5, %v674_v0  ;;  %v2099_v63 = vpack.c.bf16 %v894_v33, %v892_v62  ;;  %v893_v0 = vld [vmem:[#allocation4 + $0x1f0] sm:$0xff]  ;;  %v1113_v60 = vld [vmem:[#allocation7 + $0x198] sm:$0xff] }
 0x16c   : > { %811 = vmatprep.mubr.f32.mxu1 %v693_v3  ;;  %v685_v10 = vmul.f32 0.5, %v675_v4  ;;  %2076 = vmatprep.subr.bf16.mxu0 %v2075_v54  ;;  %v1096_v62 = vld [vmem:[#allocation7 + $0x110] sm:$0xff]  ;;  %v1097_v33 = vld [vmem:[#allocation7 + $0x118] sm:$0xff] }
 0x16d   : > { %812 = vmatmul.mubr.f32.gmra.mrb[4].mxu1 %v692_v35  ;;  %v694_v40 = vmul.f32 %v684_v8, %v2771_v2  ;;  %v2077_v2 = vpack.c.bf16 %v869_v20, %v867_v19  ;;  %v891_v35 = vld [vmem:[#allocation4 + $0x1e0] sm:$0xff] }
 0x16e   : > { %v695_v43 = vmul.f32 %v685_v10, %v2776_v9  ;;  %v2079_v9 = vpack.c.bf16 %v874_v22, %v872_v21  ;;  %v2101_v3 = vpack.c.bf16 %v893_v0, %v891_v35  ;;  %v1115_v35 = vld [vmem:[#allocation7 + $0x1a8] sm:$0xff] }
 0x16f   : > { %2078 = vmatpush1.bf16.msra.mxu0 %v2077_v2 }
 0x170   : > { %816 = vmatprep.mubr.f32.mxu1 %v695_v43  ;;  %2080 = vmatprep.subr.bf16.mxu0 %v2079_v9 }
 0x171   : > { %817 = vmatmul.mubr.f32.gmra.mrb[6].mxu1 %v694_v40 }
 0x173   : > { %2082 = vmatpush1.bf16.msra.mxu0 %v2081_v34 }
 0x174   : > { %2084 = vmatprep.subr.bf16.mxu0 %v2083_v36 }
 0x177   : > { %2086 = vmatpush1.bf16.msra.mxu0 %v2085_v39 }
 0x178   : > { %2088 = vmatprep.subr.bf16.mxu0 %v2087_v44 }
 0x17b   : > { %2090 = vmatpush1.bf16.msra.mxu0 %v2089_v47 }
 0x17c   : > { %2092 = vmatprep.subr.bf16.mxu0 %v2091_v50 }
 0x17f   : > { %2094 = vmatpush1.bf16.msra.mxu0 %v2093_v55  ;;  %v1111_v55 = vld [vmem:[#allocation7 + $0x188] sm:$0xff] }
 0x180   : > { %2096 = vmatprep.subr.bf16.mxu0 %v2095_v58  ;;  %v2103_v56 = vpack.c.bf16 %v1111_v55, %v1110_v53 }
 0x182   : > { %2104 = vmatprep.subr.bf16.mxu1 %v2103_v56 }
 0x183   : > { %2098 = vmatpush1.bf16.msra.mxu0 %v2097_v61  ;;  %v2107_v61 = vpack.c.bf16 %v1113_v60, %v1112_v59 }
 0x184   : > { %2100 = vmatprep.subr.bf16.mxu0 %v2099_v63  ;;  %v2109_v63 = vpack.c.bf16 %v1097_v33, %v1096_v62 }
 0x187   : > { %2102 = vmatpush1.bf16.msra.mxu0 %v2101_v3  ;;  %v1098_v3 = vld [vmem:[#allocation7 + $0x120] sm:$0xff] }
 0x1eb   : > { %v603_v4 = vpop.f32.mrb[8].mxu0 }
 0x1ec   : > { %v604_v8 = vadd.f32 %v603_v4, %v2727_v30  ;;  %v605_v10 = vpop.f32.mrb[9].mxu0  ;;  %v1099_v4 = vld [vmem:[#allocation7 + $0x128] sm:$0xff] }
 0x1ed   : > { %v606_v40 = vadd.f32 %v605_v10, %v2730_v31  ;;  %v1116_v10 = vld [vmem:[#allocation7 + $0x1b0] sm:$0xff] }
 0x1ee   : > { %v616_v43 = vmul.f32 %v604_v8, %v604_v8 }
 0x1ef   : > { %v617_v12 = vmul.f32 %v606_v40, %v606_v40 }
 0x1f0   : > { %v626_v13 = vmul.f32 %v616_v43, %v604_v8 }
 0x1f1   : > { %v627_v14 = vmul.f32 %v617_v12, %v606_v40  ;;  %v1100_v12 = vld [vmem:[#allocation7 + $0x130] sm:$0xff] }
 0x1f2   : > { %v636_v15 = vmul.f32 0.044715, %v626_v13  ;;  %v1101_v13 = vld [vmem:[#allocation7 + $0x138] sm:$0xff] }
 0x1f3   : > { %v637_v16 = vmul.f32 0.044715, %v627_v14  ;;  %v2117_v14 = vpack.c.bf16 %v1101_v13, %v1100_v12 }
 0x1f4   : > { %v646_v51 = vadd.f32 %v636_v15, %v604_v8  ;;  %v1118_v15 = vld [vmem:[#allocation7 + $0x1c0] sm:$0xff] }
 0x1f5   : > { %v647_v17 = vadd.f32 %v637_v16, %v606_v40  ;;  %v1119_v16 = vld [vmem:[#allocation7 + $0x1c8] sm:$0xff] }
 0x1f6   : > { %v656_v18 = vmul.f32 0.7978846, %v646_v51  ;;  %v2119_v51 = vpack.c.bf16 %v1119_v16, %v1118_v15 }
 0x1f7   : > { %v657_v54 = vmul.f32 0.7978846, %v647_v17  ;;  %v1102_v17 = vld [vmem:[#allocation7 + $0x140] sm:$0xff] }
 0x1f8   : > { %2289 = vtanh.f32 %v656_v18  ;;  %v1103_v18 = vld [vmem:[#allocation7 + $0x148] sm:$0xff] }
 0x1f9   : > { %2291 = vtanh.f32 %v657_v54  ;;  %v2121_v54 = vpack.c.bf16 %v1103_v18, %v1102_v17 }
 0x202   : > { %v2290_v19 = vpop.eup %2289 }
 0x203   : > { %v2292_v20 = vpop.eup %2291  ;;  %v676_v21 = vadd.f32 1.0, %v2290_v19  ;;  %v1120_v19 = vld [vmem:[#allocation7 + $0x1d0] sm:$0xff] }
 0x204   : > { %v677_v22 = vadd.f32 1.0, %v2292_v20  ;;  %v1121_v20 = vld [vmem:[#allocation7 + $0x1d8] sm:$0xff] }
 0x205   : > { %v686_v30 = vmul.f32 0.5, %v676_v21  ;;  %v1104_v21 = vld [vmem:[#allocation7 + $0x150] sm:$0xff] }
 0x206   : > { %v687_v2 = vmul.f32 0.5, %v677_v22  ;;  %v2123_v22 = vpack.c.bf16 %v1121_v20, %v1120_v19 }
 0x207   : > { %v696_v31 = vmul.f32 %v686_v30, %v604_v8  ;;  %v2113_v8 = vpack.c.bf16 %v1099_v4, %v1098_v3  ;;  %v1105_v30 = vld [vmem:[#allocation7 + $0x158] sm:$0xff] }
 0x208   : > { %v697_v9 = vmul.f32 %v687_v2, %v606_v40  ;;  %v1117_v40 = vld [vmem:[#allocation7 + $0x1b8] sm:$0xff]  ;;  %v1122_v2 = vld [vmem:[#allocation7 + $0x1e0] sm:$0xff] }
 0x209   : > { %v2115_v43 = vpack.c.bf16 %v1117_v40, %v1116_v10 }
 0x20a   : > { %821 = vmatprep.mubr.f32.mxu1 %v697_v9  ;;  %v1123_v9 = vld [vmem:[#allocation7 + $0x1e8] sm:$0xff] }
 0x20b   : > { %822 = vmatmul.mubr.f32.gmra.mrb[8].mxu1 %v696_v31  ;;  %v2125_v31 = vpack.c.bf16 %v1105_v30, %v1104_v21 }
 0x238   : > { %v1898_v23 = vpop.f32.mrb[0].mxu1 }
 0x239   : > { %v1899_v28 = vpop.f32.mrb[1].mxu1 }
 0x23a   : > { %v1900_v32 = vadd.f32 %v1899_v28, %v1898_v23  ;;  %v2127_v23 = vpack.c.bf16 %v1123_v9, %v1122_v2  ;;  %v1106_v28 = vld [vmem:[#allocation7 + $0x160] sm:$0xff] }
 0x23c   : > { %v804_v34 = vadd.f32 %v1900_v32, %v2801_v25  ;;  %v1901_v36 = vpop.f32.mrb[2].mxu1  ;;  %v1107_v32 = vld [vmem:[#allocation7 + $0x168] sm:$0xff] }
 0x23d   : > { %v1902_v37 = vpop.f32.mrb[3].mxu1 }
 0x23e   : > { %v2805_v38 = vadd.f32 %v804_v34, %v2678_v5  ;;  %v1903_v39 = vadd.f32 %v1902_v37, %v1901_v36  ;;  %v1124_v34 = vld [vmem:[#allocation7 + $0x1f0] sm:$0xff]  ;;  %v1125_v36 = vld [vmem:[#allocation7 + $0x1f8] sm:$0xff]  ;;  %v2129_v37 = vpack.c.bf16 %v1107_v32, %v1106_v28 }
 0x240   : > { %v809_v41 = vadd.f32 %v1903_v39, %v2801_v25  ;;  %v1904_v42 = vpop.f32.mrb[4].mxu1  ;;  %973 = vmatmul.mubr.f32.vlgmr.msra.gmra.mrb[10].mxu0 %v2805_v38  ;;  %v2131_v39 = vpack.c.bf16 %v1125_v36, %v1124_v34 }
 0x241   : > { %v1905_v44 = vpop.f32.mrb[5].mxu1  ;;  %978 = vmatprep.mubr.f32.mxu0 %v2472_v1 }
 0x242   : > { %v2811_v45 = vadd.f32 %v809_v41, %v2682_v6  ;;  %v1906_v46 = vadd.f32 %v1905_v44, %v1904_v42  ;;  %v1108_v41 = vld [vmem:[#allocation7 + $0x170] sm:$0xff]  ;;  %v1109_v42 = vld [vmem:[#allocation7 + $0x178] sm:$0xff] }
 0x243   : > { %v2133_v44 = vpack.c.bf16 %v1109_v42, %v1108_v41 }
 0x244   : > { %v814_v47 = vadd.f32 %v1906_v46, %v2801_v25  ;;  %v1907_v48 = vpop.f32.mrb[6].mxu1  ;;  %979 = vmatmul.mubr.f32.gmra.mrb[12].mxu0 %v2811_v45  ;;  %v2473_v46 = vmov 1966171168  }
 0x245   : > { %v1908_v5 = vpop.f32.mrb[7].mxu1  ;;  %984 = vmatprep.mubr.f32.mxu0 %v2472_v1 }
 0x246   : > { %v2817_v49 = vadd.f32 %v814_v47, %v2687_v7  ;;  %v1909_v50 = vadd.f32 %v1908_v5, %v1907_v48  ;;  %v1095_v7 = vld [vmem:[#allocation7 + $0x108] sm:$0xff]  ;;  %v840_v47 = vunpack.c.l.s4 %v2473_v46 }
 0x247   : > { %v2105_v58 = vpack.c.bf16 %v1095_v7, %v1094_v57 }
 0x248   : > { %v819_v52 = vadd.f32 %v1909_v50, %v2801_v25  ;;  %985 = vmatmul.mubr.f32.gmra.mrb[14].mxu0 %v2817_v49  ;;  %v841_v48 = vunpack.c.0.s8 %v840_v47 }
 0x249   : > { %990 = vmatprep.mubr.f32.mxu0 %v2472_v1  ;;  %2106 = vmatpush3.bf16.msra.mxu1 %v2105_v58  ;;  %v837_v58 = vld [vmem:[#allocation3] sm:$0x1] }
 0x24a   : > { %v2823_v6 = vadd.f32 %v819_v52, %v2693_v11  ;;  %2108 = vmatprep.subr.bf16.mxu1 %v2107_v61  ;;  %v1114_v11 = vld [vmem:[#allocation7 + $0x1a0] sm:$0xff]  ;;  %v2828_v53 = vsub.s32 %v841_v48, %v2715_v26  ;;  %v1851_v26 = vld [vmem:[%s3097_s4 + $0x2] sm:$0x3] }
 0x24b   : > { %v2111_v0 = vpack.c.bf16 %v1115_v35, %v1114_v11 }
 0x24c   : > { %991 = vmatmul.mubr.f32.gmra.mrb[16].mxu0 %v2823_v6 }
 0x24d   : > { %996 = vmatprep.mubr.f32.mxu0 %v2472_v1  ;;  %2110 = vmatpush3.bf16.msra.mxu1 %v2109_v63 }
 0x24e   : > { %2112 = vmatprep.subr.bf16.mxu1 %v2111_v0 }
 0x251   : > { %2114 = vmatpush3.bf16.msra.mxu1 %v2113_v8 }
 0x252   : > { %2116 = vmatprep.subr.bf16.mxu1 %v2115_v43 }
 0x255   : > { %2118 = vmatpush3.bf16.msra.mxu1 %v2117_v14 }
 0x256   : > { %2120 = vmatprep.subr.bf16.mxu1 %v2119_v51 }
 0x259   : > { %2122 = vmatpush3.bf16.msra.mxu1 %v2121_v54 }
 0x25a   : > { %2124 = vmatprep.subr.bf16.mxu1 %v2123_v22 }
 0x25d   : > { %2126 = vmatpush3.bf16.msra.mxu1 %v2125_v31 }
 0x25e   : > { %2128 = vmatprep.subr.bf16.mxu1 %v2127_v23 }
 0x261   : > { %2130 = vmatpush3.bf16.msra.mxu1 %v2129_v37 }
 0x262   : > { %2132 = vmatprep.subr.bf16.mxu1 %v2131_v39 }
 0x265   : > { %2134 = vmatpush3.bf16.msra.mxu1 %v2133_v44 }
 0x2de   : > { %v1910_v5 = vpop.f32.mrb[8].mxu1 }
 0x2df   : > { %v1911_v50 = vpop.f32.mrb[9].mxu1 }
 0x2e0   : > { %v1912_v52 = vadd.f32 %v1911_v50, %v1910_v5 }
 0x2e2   : > { %v824_v55 = vadd.f32 %v1912_v52, %v2801_v25  ;;  %v2842_v25 = vrot.slane %v1851_v26, %v2718_v27 }
 0x2e4   : > { %v2832_v56 = vadd.f32 %v824_v55, %v2711_v24  ;;  %v845_v57 = vrot.slane %v824_v55, %v2828_v53  ;;  %v2845_v24 = vrot.slane %v1851_v26, %v2724_v29 }
 0x2e6   : > { %v846_v7 = vcombine.high %v845_v57, %v845_v57  ;;  %997 = vmatmul.mubr.f32.gmra.mrb[18].mxu0 %v2832_v56 }
 0x2e7   : > { %1369 = vmatprep.mubr.f32.mxu0 %v2472_v1 }
 0x2e8   : > { %v853_v59 = vrot.slane %v846_v7, %v2828_v53 }
 0x2ea   : > { %v855_v60 = vadd.f32 %v853_v59, %v837_v58 }
 0x2ec   : > { %856 = vst [vmem:[#allocation3] sm:$0x1] %v855_v60 }
 0x313   : > { %v974_v61 = vpop.f32.mrb[10].mxu0 }
 0x314   : > { %v2848_v62 = vadd.f32 %v974_v61, %v2842_v25  ;;  %v976_v33 = vpop.f32.mrb[11].mxu0 }
 0x315   : > { %v2851_v63 = vadd.f32 %v976_v33, %v2845_v24 }
 0x316   : > { %v1003_v11 = vmul.f32 %v2848_v62, %v2848_v62 }
 0x317   : > { %v1004_v35 = vmul.f32 %v2851_v63, %v2851_v63  ;;  %v980_v0 = vpop.f32.mrb[12].mxu0 }
 0x318   : > { %v1013_v3 = vmul.f32 %v1003_v11, %v2848_v62  ;;  %v2859_v4 = vadd.f32 %v980_v0, %v2842_v25  ;;  %v982_v8 = vpop.f32.mrb[13].mxu0 }
 0x319   : > { %v1014_v10 = vmul.f32 %v1004_v35, %v2851_v63  ;;  %v2863_v40 = vadd.f32 %v982_v8, %v2845_v24 }
 0x31a   : > { %v1023_v43 = vmul.f32 0.044715, %v1013_v3  ;;  %v1005_v12 = vmul.f32 %v2859_v4, %v2859_v4 }
 0x31b   : > { %v1024_v13 = vmul.f32 0.044715, %v1014_v10  ;;  %v1006_v14 = vmul.f32 %v2863_v40, %v2863_v40  ;;  %v986_v15 = vpop.f32.mrb[14].mxu0 }
 0x31c   : > { %v1033_v16 = vadd.f32 %v1023_v43, %v2848_v62  ;;  %v1015_v51 = vmul.f32 %v1005_v12, %v2859_v4  ;;  %v2872_v17 = vadd.f32 %v986_v15, %v2842_v25  ;;  %v988_v18 = vpop.f32.mrb[15].mxu0 }
 0x31d   : > { %v1034_v54 = vadd.f32 %v1024_v13, %v2851_v63  ;;  %v1016_v19 = vmul.f32 %v1006_v14, %v2863_v40  ;;  %v2877_v20 = vadd.f32 %v988_v18, %v2845_v24 }
 0x31e   : > { %v1043_v21 = vmul.f32 0.7978846, %v1033_v16  ;;  %v1025_v22 = vmul.f32 0.044715, %v1015_v51  ;;  %v1007_v30 = vmul.f32 %v2872_v17, %v2872_v17 }
 0x31f   : > { %v1044_v2 = vmul.f32 0.7978846, %v1034_v54  ;;  %v1026_v9 = vmul.f32 0.044715, %v1016_v19  ;;  %v1008_v31 = vmul.f32 %v2877_v20, %v2877_v20  ;;  %v992_v23 = vpop.f32.mrb[16].mxu0 }
 0x320   : > { %2293 = vtanh.f32 %v1043_v21  ;;  %v1035_v28 = vadd.f32 %v1025_v22, %v2859_v4  ;;  %v1017_v32 = vmul.f32 %v1007_v30, %v2872_v17  ;;  %v2886_v34 = vadd.f32 %v992_v23, %v2842_v25  ;;  %v994_v36 = vpop.f32.mrb[17].mxu0 }
 0x321   : > { %v1036_v37 = vadd.f32 %v1026_v9, %v2863_v40  ;;  %v1018_v39 = vmul.f32 %v1008_v31, %v2877_v20  ;;  %v2891_v41 = vadd.f32 %v994_v36, %v2845_v24  ;;  %2295 = vtanh.f32 %v1044_v2 }
 0x322   : > { %v1045_v42 = vmul.f32 0.7978846, %v1035_v28  ;;  %v1027_v44 = vmul.f32 0.044715, %v1017_v32  ;;  %v1009_v46 = vmul.f32 %v2886_v34, %v2886_v34 }
 0x323   : > { %v1046_v47 = vmul.f32 0.7978846, %v1036_v37  ;;  %v1028_v48 = vmul.f32 0.044715, %v1018_v39  ;;  %v1010_v5 = vmul.f32 %v2891_v41, %v2891_v41 }
 0x324   : > { %v1037_v50 = vadd.f32 %v1027_v44, %v2872_v17  ;;  %v1019_v52 = vmul.f32 %v1009_v46, %v2886_v34  ;;  %2297 = vtanh.f32 %v1045_v42  ;;  %v1261_v44 = vld [vmem:[#allocation4 + $0x208] sm:$0xff]  ;;  %v1263_v46 = vld [vmem:[#allocation4 + $0x218] sm:$0xff] }
 0x325   : > { %v1038_v55 = vadd.f32 %v1028_v48, %v2877_v20  ;;  %v1020_v57 = vmul.f32 %v1010_v5, %v2891_v41  ;;  %2299 = vtanh.f32 %v1046_v47  ;;  %v1260_v47 = vld [vmem:[#allocation4 + $0x200] sm:$0xff]  ;;  %v2135_v48 = vpack.c.bf16 %v1263_v46, %v1261_v44  ;;  %v1262_v5 = vld [vmem:[#allocation4 + $0x210] sm:$0xff] }
 0x326   : > { %v1047_v7 = vmul.f32 0.7978846, %v1037_v50  ;;  %v1029_v58 = vmul.f32 0.044715, %v1019_v52  ;;  %v1267_v50 = vld [vmem:[#allocation4 + $0x238] sm:$0xff]  ;;  %v2137_v52 = vpack.c.bf16 %v1262_v5, %v1260_v47 }
 0x327   : > { %v1048_v59 = vmul.f32 0.7978846, %v1038_v55  ;;  %v1030_v60 = vmul.f32 0.044715, %v1020_v57  ;;  %v1264_v55 = vld [vmem:[#allocation4 + $0x220] sm:$0xff]  ;;  %v1266_v57 = vld [vmem:[#allocation4 + $0x230] sm:$0xff]  ;;  %2136 = vmatprep.subr.bf16.mxu0 %v2135_v48 }
 0x328   : > { %v1039_v26 = vadd.f32 %v1029_v58, %v2886_v34  ;;  %2301 = vtanh.f32 %v1047_v7  ;;  %v1269_v7 = vld [vmem:[#allocation4 + $0x248] sm:$0xff]  ;;  %v1271_v58 = vld [vmem:[#allocation4 + $0x258] sm:$0xff]  ;;  %2138 = vmatpush1.bf16.msra.mxu0 %v2137_v52 }
 0x329   : > { %v1040_v61 = vadd.f32 %v1030_v60, %v2891_v41  ;;  %2303 = vtanh.f32 %v1048_v59  ;;  %v1268_v59 = vld [vmem:[#allocation4 + $0x240] sm:$0xff]  ;;  %v1270_v60 = vld [vmem:[#allocation4 + $0x250] sm:$0xff] }
 0x32a   : > { %v2294_v33 = vpop.eup %2293  ;;  %v1049_v11 = vmul.f32 0.7978846, %v1039_v26  ;;  %v1273_v26 = vld [vmem:[#allocation4 + $0x268] sm:$0xff] }
 0x32b   : > { %v2296_v35 = vpop.eup %2295  ;;  %v1063_v0 = vadd.f32 1.0, %v2294_v33  ;;  %v1050_v3 = vmul.f32 0.7978846, %v1040_v61  ;;  %v1275_v61 = vld [vmem:[#allocation4 + $0x278] sm:$0xff]  ;;  %v2145_v33 = vpack.c.bf16 %v1270_v60, %v1268_v59 }
 0x32c   : > { %v1064_v8 = vadd.f32 1.0, %v2296_v35  ;;  %2305 = vtanh.f32 %v1049_v11  ;;  %v2147_v11 = vpack.c.bf16 %v1275_v61, %v1273_v26  ;;  %v1272_v35 = vld [vmem:[#allocation4 + $0x260] sm:$0xff]  ;;  %v2916_v60 = vld [vmem:[%s3099_s6 + $0x1] ss:$0 sm:$0xff] }
 0x32d   : > { %v1073_v10 = vmul.f32 0.5, %v1063_v0  ;;  %2307 = vtanh.f32 %v1050_v3  ;;  %v1274_v0 = vld [vmem:[#allocation4 + $0x270] sm:$0xff] }
 0x32e   : > { %v2298_v43 = vpop.eup %2297  ;;  %v1074_v12 = vmul.f32 0.5, %v1064_v8  ;;  %v2149_v3 = vpack.c.bf16 %v1274_v0, %v1272_v35  ;;  %v1277_v8 = vld [vmem:[#allocation4 + $0x288] sm:$0xff] }
 0x32f   : > { %v2300_v13 = vpop.eup %2299  ;;  %v1083_v14 = vmul.f32 %v1073_v10, %v2848_v62  ;;  %v1065_v15 = vadd.f32 1.0, %v2298_v43  ;;  %v1279_v10 = vld [vmem:[#allocation4 + $0x298] sm:$0xff] }
 0x330   : > { %v1084_v16 = vmul.f32 %v1074_v12, %v2851_v63  ;;  %v1066_v51 = vadd.f32 1.0, %v2300_v13  ;;  %v2151_v43 = vpack.c.bf16 %v1279_v10, %v1277_v8  ;;  %v1276_v12 = vld [vmem:[#allocation4 + $0x280] sm:$0xff]  ;;  %v1278_v13 = vld [vmem:[#allocation4 + $0x290] sm:$0xff] }
 0x331   : > { %v1075_v18 = vmul.f32 0.5, %v1065_v15  ;;  %v1281_v15 = vld [vmem:[#allocation4 + $0x2a8] sm:$0xff] }
 0x332   : > { %v2302_v54 = vpop.eup %2301  ;;  %1198 = vmatprep.mubr.f32.mxu1 %v1084_v16  ;;  %v1076_v19 = vmul.f32 0.5, %v1066_v51  ;;  %v1283_v16 = vld [vmem:[#allocation4 + $0x2b8] sm:$0xff] }
 0x333   : > { %v2304_v21 = vpop.eup %2303  ;;  %1199 = vmatmul.mubr.f32.vlgmr.msra.gmra.mrb[10].mxu1 %v1083_v14  ;;  %v1085_v22 = vmul.f32 %v1075_v18, %v2859_v4  ;;  %v1067_v30 = vadd.f32 1.0, %v2302_v54  ;;  %v2153_v14 = vpack.c.bf16 %v1278_v13, %v1276_v12  ;;  %v2155_v51 = vpack.c.bf16 %v1283_v16, %v1281_v15  ;;  %v1280_v18 = vld [vmem:[#allocation4 + $0x2a0] sm:$0xff]  ;;  %v1282_v54 = vld [vmem:[#allocation4 + $0x2b0] sm:$0xff] }
 0x334   : > { %v1086_v2 = vmul.f32 %v1076_v19, %v2863_v40  ;;  %v1068_v9 = vadd.f32 1.0, %v2304_v21  ;;  %v2157_v19 = vpack.c.bf16 %v1282_v54, %v1280_v18  ;;  %v1285_v21 = vld [vmem:[#allocation4 + $0x2c8] sm:$0xff]  ;;  %v1507_v54 = vld [vmem:[#allocation7 + $0x280] sm:$0xff] }
 0x335   : > { %v1077_v31 = vmul.f32 0.5, %v1067_v30 }
 0x336   : > { %v2306_v23 = vpop.eup %2305  ;;  %1203 = vmatprep.mubr.f32.mxu1 %v1086_v2  ;;  %v1078_v62 = vmul.f32 0.5, %v1068_v9  ;;  %v1284_v2 = vld [vmem:[#allocation4 + $0x2c0] sm:$0xff]  ;;  %v1286_v9 = vld [vmem:[#allocation4 + $0x2d0] sm:$0xff] }
 0x337   : > { %v2308_v28 = vpop.eup %2307  ;;  %1204 = vmatmul.mubr.f32.gmra.mrb[12].mxu1 %v1085_v22  ;;  %v1087_v63 = vmul.f32 %v1077_v31, %v2872_v17  ;;  %v1069_v32 = vadd.f32 1.0, %v2306_v23  ;;  %v1265_v17 = vld [vmem:[#allocation4 + $0x228] sm:$0xff]  ;;  %v1287_v22 = vld [vmem:[#allocation4 + $0x2d8] sm:$0xff]  ;;  %v2161_v31 = vpack.c.bf16 %v1286_v9, %v1284_v2  ;;  %v1509_v2 = vld [vmem:[#allocation7 + $0x290] sm:$0xff] }
 0x338   : > { %v1088_v36 = vmul.f32 %v1078_v62, %v2877_v20  ;;  %v1070_v37 = vadd.f32 1.0, %v2308_v28  ;;  %v2139_v20 = vpack.c.bf16 %v1267_v50, %v1265_v17  ;;  %v2159_v30 = vpack.c.bf16 %v1287_v22, %v1285_v21  ;;  %v1289_v23 = vld [vmem:[#allocation4 + $0x2e8] sm:$0xff]  ;;  %v1291_v62 = vld [vmem:[#allocation4 + $0x2f8] sm:$0xff]  ;;  %v1491_v22 = vld [vmem:[#allocation7 + $0x200] sm:$0xff] }
 0x339   : > { %v1079_v39 = vmul.f32 0.5, %v1069_v32  ;;  %v2163_v28 = vpack.c.bf16 %v1291_v62, %v1289_v23  ;;  %v1290_v32 = vld [vmem:[#allocation4 + $0x2f0] sm:$0xff]  ;;  %v1510_v9 = vld [vmem:[#allocation7 + $0x298] sm:$0xff] }
 0x33a   : > { %1208 = vmatprep.mubr.f32.mxu1 %v1088_v36  ;;  %v1080_v42 = vmul.f32 0.5, %v1070_v37  ;;  %2140 = vmatprep.subr.bf16.mxu0 %v2139_v20  ;;  %v1493_v23 = vld [vmem:[#allocation7 + $0x210] sm:$0xff]  ;;  %v1494_v62 = vld [vmem:[#allocation7 + $0x218] sm:$0xff] }
 0x33b   : > { %1209 = vmatmul.mubr.f32.gmra.mrb[14].mxu1 %v1087_v63  ;;  %v1089_v4 = vmul.f32 %v1079_v39, %v2886_v34  ;;  %v2141_v34 = vpack.c.bf16 %v1266_v57, %v1264_v55  ;;  %v1288_v63 = vld [vmem:[#allocation4 + $0x2e0] sm:$0xff] }
 0x33c   : > { %v1090_v40 = vmul.f32 %v1080_v42, %v2891_v41  ;;  %v2143_v41 = vpack.c.bf16 %v1271_v58, %v1269_v7  ;;  %v2165_v36 = vpack.c.bf16 %v1290_v32, %v1288_v63  ;;  %v1512_v63 = vld [vmem:[#allocation7 + $0x2a8] sm:$0xff] }
 0x33d   : > { %2142 = vmatpush1.bf16.msra.mxu0 %v2141_v34 }
 0x33e   : > { %1213 = vmatprep.mubr.f32.mxu1 %v1090_v40  ;;  %2144 = vmatprep.subr.bf16.mxu0 %v2143_v41 }
 0x33f   : > { %1214 = vmatmul.mubr.f32.gmra.mrb[16].mxu1 %v1089_v4 }
 0x341   : > { %2146 = vmatpush1.bf16.msra.mxu0 %v2145_v33 }
 0x342   : > { %2148 = vmatprep.subr.bf16.mxu0 %v2147_v11 }
 0x345   : > { %2150 = vmatpush1.bf16.msra.mxu0 %v2149_v3 }
 0x346   : > { %2152 = vmatprep.subr.bf16.mxu0 %v2151_v43 }
 0x349   : > { %2154 = vmatpush1.bf16.msra.mxu0 %v2153_v14 }
 0x34a   : > { %2156 = vmatprep.subr.bf16.mxu0 %v2155_v51 }
 0x34d   : > { %2158 = vmatpush1.bf16.msra.mxu0 %v2157_v19  ;;  %v1508_v19 = vld [vmem:[#allocation7 + $0x288] sm:$0xff] }
 0x34e   : > { %2160 = vmatprep.subr.bf16.mxu0 %v2159_v30  ;;  %v2167_v21 = vpack.c.bf16 %v1508_v19, %v1507_v54  ;;  %v1234_v19 = vld [vmem:[#allocation3] sm:$0x1] }
 0x350   : > { %2168 = vmatprep.subr.bf16.mxu1 %v2167_v21 }
 0x351   : > { %2162 = vmatpush1.bf16.msra.mxu0 %v2161_v31  ;;  %v2171_v31 = vpack.c.bf16 %v1510_v9, %v1509_v2 }
 0x352   : > { %2164 = vmatprep.subr.bf16.mxu0 %v2163_v28  ;;  %v2173_v28 = vpack.c.bf16 %v1494_v62, %v1493_v23 }
 0x355   : > { %2166 = vmatpush1.bf16.msra.mxu0 %v2165_v36  ;;  %v1496_v36 = vld [vmem:[#allocation7 + $0x228] sm:$0xff] }
 0x3b9   : > { %v998_v37 = vpop.f32.mrb[18].mxu0 }
 0x3ba   : > { %v999_v39 = vadd.f32 %v998_v37, %v2842_v25  ;;  %v1000_v42 = vpop.f32.mrb[19].mxu0 }
 0x3bb   : > { %v1001_v4 = vadd.f32 %v1000_v42, %v2845_v24  ;;  %v1514_v42 = vld [vmem:[#allocation7 + $0x2b8] sm:$0xff] }
 0x3bc   : > { %v1011_v40 = vmul.f32 %v999_v39, %v999_v39 }
 0x3bd   : > { %v1012_v44 = vmul.f32 %v1001_v4, %v1001_v4 }
 0x3be   : > { %v1021_v46 = vmul.f32 %v1011_v40, %v999_v39  ;;  %v1497_v40 = vld [vmem:[#allocation7 + $0x230] sm:$0xff] }
 0x3bf   : > { %v1022_v47 = vmul.f32 %v1012_v44, %v1001_v4  ;;  %v1498_v44 = vld [vmem:[#allocation7 + $0x238] sm:$0xff] }
 0x3c0   : > { %v1031_v48 = vmul.f32 0.044715, %v1021_v46  ;;  %v2181_v46 = vpack.c.bf16 %v1498_v44, %v1497_v40 }
 0x3c1   : > { %v1032_v5 = vmul.f32 0.044715, %v1022_v47  ;;  %v1515_v47 = vld [vmem:[#allocation7 + $0x2c0] sm:$0xff] }
 0x3c2   : > { %v1041_v17 = vadd.f32 %v1031_v48, %v999_v39  ;;  %v1516_v48 = vld [vmem:[#allocation7 + $0x2c8] sm:$0xff] }
 0x3c3   : > { %v1042_v50 = vadd.f32 %v1032_v5, %v1001_v4  ;;  %v2183_v5 = vpack.c.bf16 %v1516_v48, %v1515_v47 }
 0x3c4   : > { %v1051_v52 = vmul.f32 0.7978846, %v1041_v17  ;;  %v1499_v17 = vld [vmem:[#allocation7 + $0x240] sm:$0xff] }
 0x3c5   : > { %v1052_v20 = vmul.f32 0.7978846, %v1042_v50  ;;  %v1500_v50 = vld [vmem:[#allocation7 + $0x248] sm:$0xff] }
 0x3c6   : > { %2309 = vtanh.f32 %v1051_v52  ;;  %v2185_v52 = vpack.c.bf16 %v1500_v50, %v1499_v17 }
 0x3c7   : > { %2311 = vtanh.f32 %v1052_v20  ;;  %v1517_v20 = vld [vmem:[#allocation7 + $0x2d0] sm:$0xff] }
 0x3d0   : > { %v2310_v55 = vpop.eup %2309 }
 0x3d1   : > { %v2312_v57 = vpop.eup %2311  ;;  %v1071_v7 = vadd.f32 1.0, %v2310_v55  ;;  %v1518_v55 = vld [vmem:[#allocation7 + $0x2d8] sm:$0xff] }
 0x3d2   : > { %v1072_v58 = vadd.f32 1.0, %v2312_v57  ;;  %v1501_v57 = vld [vmem:[#allocation7 + $0x250] sm:$0xff] }
 0x3d3   : > { %v1081_v25 = vmul.f32 0.5, %v1071_v7  ;;  %v2187_v7 = vpack.c.bf16 %v1518_v55, %v1517_v20 }
 0x3d4   : > { %v1082_v34 = vmul.f32 0.5, %v1072_v58  ;;  %v1502_v58 = vld [vmem:[#allocation7 + $0x258] sm:$0xff] }
 0x3d5   : > { %v1091_v24 = vmul.f32 %v1081_v25, %v999_v39  ;;  %v1513_v39 = vld [vmem:[#allocation7 + $0x2b0] sm:$0xff]  ;;  %v1519_v25 = vld [vmem:[#allocation7 + $0x2e0] sm:$0xff] }
 0x3d6   : > { %v1092_v41 = vmul.f32 %v1082_v34, %v1001_v4  ;;  %v2179_v4 = vpack.c.bf16 %v1514_v42, %v1513_v39  ;;  %v1520_v34 = vld [vmem:[#allocation7 + $0x2e8] sm:$0xff] }
 0x3d8   : > { %1218 = vmatprep.mubr.f32.mxu1 %v1092_v41  ;;  %v2189_v41 = vpack.c.bf16 %v1502_v58, %v1501_v57 }
 0x3d9   : > { %1219 = vmatmul.mubr.f32.gmra.mrb[18].mxu1 %v1091_v24  ;;  %v2191_v24 = vpack.c.bf16 %v1520_v34, %v1519_v25 }
 0x406   : > { %v1945_v59 = vpop.f32.mrb[10].mxu1 }
 0x407   : > { %v1946_v26 = vpop.f32.mrb[11].mxu1 }
 0x408   : > { %v1947_v61 = vadd.f32 %v1946_v26, %v1945_v59  ;;  %v1503_v59 = vld [vmem:[#allocation7 + $0x260] sm:$0xff]  ;;  %v1504_v26 = vld [vmem:[#allocation7 + $0x268] sm:$0xff] }
 0x40a   : > { %v1201_v33 = vadd.f32 %v1947_v61, %v2916_v60  ;;  %v1948_v11 = vpop.f32.mrb[12].mxu1  ;;  %v1521_v61 = vld [vmem:[#allocation7 + $0x2f0] sm:$0xff] }
 0x40b   : > { %v1949_v35 = vpop.f32.mrb[13].mxu1 }
 0x40c   : > { %v2920_v0 = vadd.f32 %v1201_v33, %v2805_v38  ;;  %v1950_v3 = vadd.f32 %v1949_v35, %v1948_v11  ;;  %v1522_v33 = vld [vmem:[#allocation7 + $0x2f8] sm:$0xff]  ;;  %v2193_v11 = vpack.c.bf16 %v1504_v26, %v1503_v59 }
 0x40d   : > { %v2195_v35 = vpack.c.bf16 %v1522_v33, %v1521_v61 }
 0x40e   : > { %v1206_v8 = vadd.f32 %v1950_v3, %v2916_v60  ;;  %v1951_v10 = vpop.f32.mrb[14].mxu1  ;;  %1370 = vmatmul.mubr.f32.vlgmr.msra.gmra.mrb[20].mxu0 %v2920_v0  ;;  %v1505_v3 = vld [vmem:[#allocation7 + $0x270] sm:$0xff] }
 0x40f   : > { %v1952_v43 = vpop.f32.mrb[15].mxu1  ;;  %1375 = vmatprep.mubr.f32.mxu0 %v2472_v1 }
 0x410   : > { %v2926_v12 = vadd.f32 %v1206_v8, %v2811_v45  ;;  %v1953_v13 = vadd.f32 %v1952_v43, %v1951_v10  ;;  %v1506_v8 = vld [vmem:[#allocation7 + $0x278] sm:$0xff] }
 0x411   : > { %v2197_v10 = vpack.c.bf16 %v1506_v8, %v1505_v3 }
 0x412   : > { %v1211_v14 = vadd.f32 %v1953_v13, %v2916_v60  ;;  %v1954_v15 = vpop.f32.mrb[16].mxu1  ;;  %1376 = vmatmul.mubr.f32.gmra.mrb[22].mxu0 %v2926_v12 }
 0x413   : > { %v1955_v38 = vpop.f32.mrb[17].mxu1  ;;  %1381 = vmatprep.mubr.f32.mxu0 %v2472_v1 }
 0x414   : > { %v2932_v16 = vadd.f32 %v1211_v14, %v2817_v49  ;;  %v1956_v51 = vadd.f32 %v1955_v38, %v1954_v15  ;;  %v1492_v49 = vld [vmem:[#allocation7 + $0x208] sm:$0xff] }
 0x415   : > { %v2169_v30 = vpack.c.bf16 %v1492_v49, %v1491_v22  ;;  %v1854_v22 = vld [vmem:[%s3097_s4 + $0x4] sm:$0x3] }
 0x416   : > { %v1216_v18 = vadd.f32 %v1956_v51, %v2916_v60  ;;  %1382 = vmatmul.mubr.f32.gmra.mrb[24].mxu0 %v2932_v16  ;;  %v2953_v49 = vrot.slane %v1854_v22, %v2718_v27 }
 0x417   : > { %1387 = vmatprep.mubr.f32.mxu0 %v2472_v1  ;;  %2170 = vmatpush3.bf16.msra.mxu1 %v2169_v30 }
 0x418   : > { %v2938_v45 = vadd.f32 %v1216_v18, %v2823_v6  ;;  %2172 = vmatprep.subr.bf16.mxu1 %v2171_v31  ;;  %v1511_v6 = vld [vmem:[#allocation7 + $0x2a0] sm:$0xff] }
 0x419   : > { %v2175_v32 = vpack.c.bf16 %v1512_v63, %v1511_v6 }
 0x41a   : > { %1388 = vmatmul.mubr.f32.gmra.mrb[26].mxu0 %v2938_v45 }
 0x41b   : > { %1393 = vmatprep.mubr.f32.mxu0 %v2472_v1  ;;  %2174 = vmatpush3.bf16.msra.mxu1 %v2173_v28  ;;  %v1495_v1 = vld [vmem:[#allocation7 + $0x220] sm:$0xff] }
 0x41c   : > { %v2177_v37 = vpack.c.bf16 %v1496_v36, %v1495_v1  ;;  %2176 = vmatprep.subr.bf16.mxu1 %v2175_v32 }
 0x41f   : > { %2178 = vmatpush3.bf16.msra.mxu1 %v2177_v37 }
 0x420   : > { %2180 = vmatprep.subr.bf16.mxu1 %v2179_v4 }
 0x423   : > { %2182 = vmatpush3.bf16.msra.mxu1 %v2181_v46 }
 0x424   : > { %2184 = vmatprep.subr.bf16.mxu1 %v2183_v5 }
 0x427   : > { %2186 = vmatpush3.bf16.msra.mxu1 %v2185_v52 }
 0x428   : > { %2188 = vmatprep.subr.bf16.mxu1 %v2187_v7 }
 0x42b   : > { %2190 = vmatpush3.bf16.msra.mxu1 %v2189_v41 }
 0x42c   : > { %2192 = vmatprep.subr.bf16.mxu1 %v2191_v24 }
 0x42f   : > { %2194 = vmatpush3.bf16.msra.mxu1 %v2193_v11 }
 0x430   : > { %2196 = vmatprep.subr.bf16.mxu1 %v2195_v35 }
 0x433   : > { %2198 = vmatpush3.bf16.msra.mxu1 %v2197_v10 }
 0x4ac   : > { %v1957_v43 = vpop.f32.mrb[18].mxu1 }
 0x4ad   : > { %v1958_v13 = vpop.f32.mrb[19].mxu1 }
 0x4ae   : > { %v1959_v14 = vadd.f32 %v1958_v13, %v1957_v43 }
 0x4b0   : > { %v1221_v15 = vadd.f32 %v1959_v14, %v2916_v60 }
 0x4b2   : > { %v2944_v38 = vadd.f32 %v1221_v15, %v2832_v56  ;;  %v1242_v51 = vrot.slane %v1221_v15, %v2828_v53  ;;  %v2956_v56 = vrot.slane %v1854_v22, %v2724_v29 }
 0x4b4   : > { %v1243_v18 = vcombine.high %v1242_v51, %v1242_v51  ;;  %1394 = vmatmul.mubr.f32.gmra.mrb[28].mxu0 %v2944_v38 }
 0x4b6   : > { %v1250_v54 = vrot.slane %v1243_v18, %v2828_v53 }
 0x4b8   : > { %v1252_v21 = vadd.f32 %v1250_v54, %v1234_v19 }
 0x4ba   : > { %1253 = vst [vmem:[#allocation3] sm:$0x1] %v1252_v21 }
 0x4e1   : > { %v1371_v60 = vpop.f32.mrb[20].mxu0 }
 0x4e2   : > { %v2959_v30 = vadd.f32 %v1371_v60, %v2953_v49  ;;  %v1373_v2 = vpop.f32.mrb[21].mxu0 }
 0x4e3   : > { %v2962_v9 = vadd.f32 %v1373_v2, %v2956_v56 }
 0x4e4   : > { %v1400_v31 = vmul.f32 %v2959_v30, %v2959_v30 }
 0x4e5   : > { %v1401_v23 = vmul.f32 %v2962_v9, %v2962_v9  ;;  %v1377_v62 = vpop.f32.mrb[22].mxu0 }
 0x4e6   : > { %v1410_v27 = vmul.f32 %v1400_v31, %v2959_v30  ;;  %v2970_v29 = vadd.f32 %v1377_v62, %v2953_v49  ;;  %v1379_v28 = vpop.f32.mrb[23].mxu0 }
 0x4e7   : > { %v1411_v6 = vmul.f32 %v1401_v23, %v2962_v9  ;;  %v2974_v63 = vadd.f32 %v1379_v28, %v2956_v56 }
 0x4e8   : > { %v1420_v32 = vmul.f32 0.044715, %v1410_v27  ;;  %v1402_v1 = vmul.f32 %v2970_v29, %v2970_v29 }
 0x4e9   : > { %v1421_v36 = vmul.f32 0.044715, %v1411_v6  ;;  %v1403_v37 = vmul.f32 %v2974_v63, %v2974_v63  ;;  %v1383_v39 = vpop.f32.mrb[24].mxu0 }
 0x4ea   : > { %v1430_v42 = vadd.f32 %v1420_v32, %v2959_v30  ;;  %v1412_v4 = vmul.f32 %v1402_v1, %v2970_v29  ;;  %v2983_v40 = vadd.f32 %v1383_v39, %v2953_v49  ;;  %v1385_v44 = vpop.f32.mrb[25].mxu0 }
 0x4eb   : > { %v1431_v46 = vadd.f32 %v1421_v36, %v2962_v9  ;;  %v1413_v47 = vmul.f32 %v1403_v37, %v2974_v63  ;;  %v2988_v48 = vadd.f32 %v1385_v44, %v2956_v56 }
 0x4ec   : > { %v1440_v5 = vmul.f32 0.7978846, %v1430_v42  ;;  %v1422_v17 = vmul.f32 0.044715, %v1412_v4  ;;  %v1404_v50 = vmul.f32 %v2983_v40, %v2983_v40 }
 0x4ed   : > { %v1441_v52 = vmul.f32 0.7978846, %v1431_v46  ;;  %v1423_v20 = vmul.f32 0.044715, %v1413_v47  ;;  %v1405_v55 = vmul.f32 %v2988_v48, %v2988_v48  ;;  %v1389_v57 = vpop.f32.mrb[26].mxu0 }
 0x4ee   : > { %2313 = vtanh.f32 %v1440_v5  ;;  %v1432_v7 = vadd.f32 %v1422_v17, %v2970_v29  ;;  %v1414_v58 = vmul.f32 %v1404_v50, %v2983_v40  ;;  %v2997_v25 = vadd.f32 %v1389_v57, %v2953_v49  ;;  %v1391_v34 = vpop.f32.mrb[27].mxu0 }
 0x4ef   : > { %v1433_v41 = vadd.f32 %v1423_v20, %v2974_v63  ;;  %v1415_v24 = vmul.f32 %v1405_v55, %v2988_v48  ;;  %v1392_v59 = vadd.f32 %v1391_v34, %v2956_v56  ;;  %2315 = vtanh.f32 %v1441_v52 }
 0x4f0   : > { %v1442_v26 = vmul.f32 0.7978846, %v1432_v7  ;;  %v1424_v61 = vmul.f32 0.044715, %v1414_v58  ;;  %v1406_v33 = vmul.f32 %v2997_v25, %v2997_v25 }
 0x4f1   : > { %v1443_v11 = vmul.f32 0.7978846, %v1433_v41  ;;  %v1425_v35 = vmul.f32 0.044715, %v1415_v24  ;;  %v1407_v3 = vmul.f32 %v1392_v59, %v1392_v59 }
 0x4f2   : > { %v1434_v8 = vadd.f32 %v1424_v61, %v2983_v40  ;;  %v1416_v10 = vmul.f32 %v1406_v33, %v2997_v25  ;;  %2317 = vtanh.f32 %v1442_v26 }
 0x4f3   : > { %v1435_v43 = vadd.f32 %v1425_v35, %v2988_v48  ;;  %v1417_v13 = vmul.f32 %v1407_v3, %v1392_v59  ;;  %2319 = vtanh.f32 %v1443_v11 }
 0x4f4   : > { %v1444_v14 = vmul.f32 0.7978846, %v1434_v8  ;;  %v1426_v15 = vmul.f32 0.044715, %v1416_v10 }
 0x4f5   : > { %v1445_v51 = vmul.f32 0.7978846, %v1435_v43  ;;  %v1427_v18 = vmul.f32 0.044715, %v1417_v13 }
 0x4f6   : > { %v1436_v54 = vadd.f32 %v1426_v15, %v2997_v25  ;;  %2321 = vtanh.f32 %v1444_v14 }
 0x4f7   : > { %v1437_v19 = vadd.f32 %v1427_v18, %v1392_v59  ;;  %2323 = vtanh.f32 %v1445_v51 }
 0x4f8   : > { %v2314_v21 = vpop.eup %2313  ;;  %v1446_v22 = vmul.f32 0.7978846, %v1436_v54 }
 0x4f9   : > { %v2316_v60 = vpop.eup %2315  ;;  %v1460_v2 = vadd.f32 1.0, %v2314_v21  ;;  %v1447_v31 = vmul.f32 0.7978846, %v1437_v19  ;;  %v1856_v19 = vld [vmem:[%s3099_s6 + $0x2] ss:$0 sm:$0xff] }
 0x4fa   : > { %v1461_v23 = vadd.f32 1.0, %v2316_v60  ;;  %2325 = vtanh.f32 %v1446_v22 }
 0x4fb   : > { %v1470_v62 = vmul.f32 0.5, %v1460_v2  ;;  %2327 = vtanh.f32 %v1447_v31 }
 0x4fc   : > { %v2318_v27 = vpop.eup %2317  ;;  %v1471_v28 = vmul.f32 0.5, %v1461_v23 }
 0x4fd   : > { %v2320_v6 = vpop.eup %2319  ;;  %v1462_v32 = vadd.f32 1.0, %v2318_v27  ;;  %v1480_v37 = vmul.f32 %v1470_v62, %v2959_v30 }
 0x4fe   : > { %v1481_v1 = vmul.f32 %v1471_v28, %v2962_v9  ;;  %v1463_v36 = vadd.f32 1.0, %v2320_v6 }
 0x4ff   : > { %v1472_v39 = vmul.f32 0.5, %v1462_v32 }
 0x500   : > { %v2322_v42 = vpop.eup %2321  ;;  %1595 = vmatprep.mubr.f32.mxu1 %v1481_v1  ;;  %v1473_v4 = vmul.f32 0.5, %v1463_v36 }
 0x501   : > { %v2324_v44 = vpop.eup %2323  ;;  %1596 = vmatmul.mubr.f32.vlgmr.msra.gmra.mrb[20].mxu1 %v1480_v37  ;;  %v1464_v46 = vadd.f32 1.0, %v2322_v42  ;;  %v1482_v17 = vmul.f32 %v1472_v39, %v2970_v29 }
 0x502   : > { %v1483_v47 = vmul.f32 %v1473_v4, %v2974_v63  ;;  %v1465_v5 = vadd.f32 1.0, %v2324_v44 }
 0x503   : > { %v1474_v50 = vmul.f32 0.5, %v1464_v46 }
 0x504   : > { %v2326_v52 = vpop.eup %2325  ;;  %1600 = vmatprep.mubr.f32.mxu1 %v1483_v47  ;;  %v1475_v20 = vmul.f32 0.5, %v1465_v5 }
 0x505   : > { %v2328_v9 = vpop.eup %2327  ;;  %1601 = vmatmul.mubr.f32.gmra.mrb[22].mxu1 %v1482_v17  ;;  %v1466_v55 = vadd.f32 1.0, %v2326_v52  ;;  %v1484_v7 = vmul.f32 %v1474_v50, %v2983_v40 }
 0x506   : > { %v1485_v30 = vmul.f32 %v1475_v20, %v2988_v48  ;;  %v1467_v57 = vadd.f32 1.0, %v2328_v9  ;;  %v1631_v20 = vld [vmem:[#allocation3] sm:$0x1] }
 0x507   : > { %v1476_v58 = vmul.f32 0.5, %v1466_v55 }
 0x508   : > { %1605 = vmatprep.mubr.f32.mxu1 %v1485_v30  ;;  %v1477_v34 = vmul.f32 0.5, %v1467_v57  ;;  %v2334_v30 = vld [vmem:[%s2705_s29 + $0x8] sm:$0xff] }
 0x509   : > { %1606 = vmatmul.mubr.f32.gmra.mrb[24].mxu1 %v1484_v7  ;;  %v1486_v41 = vmul.f32 %v1476_v58, %v2997_v25  ;;  %v2335_v7 = vld [vmem:[%s2705_s29 + $0x10] sm:$0xff] }
 0x50a   : > { %v1487_v63 = vmul.f32 %v1477_v34, %v1392_v59  ;;  %v2336_v34 = vld [vmem:[%s2705_s29 + $0x18] sm:$0xff] }
 0x50c   : > { %1610 = vmatprep.mubr.f32.mxu1 %v1487_v63 }
 0x50d   : > { %1611 = vmatmul.mubr.f32.gmra.mrb[26].mxu1 %v1486_v41 }
 0x587   : > { %v1395_v29 = vpop.f32.mrb[28].mxu0 }
 0x588   : > { %v1396_v24 = vadd.f32 %v1395_v29, %v2953_v49  ;;  %v1397_v26 = vpop.f32.mrb[29].mxu0 }
 0x589   : > { %v1398_v61 = vadd.f32 %v1397_v26, %v2956_v56 }
 0x58a   : > { %v1408_v33 = vmul.f32 %v1396_v24, %v1396_v24 }
 0x58b   : > { %v1409_v48 = vmul.f32 %v1398_v61, %v1398_v61 }
 0x58c   : > { %v1418_v11 = vmul.f32 %v1408_v33, %v1396_v24 }
 0x58d   : > { %v1419_v35 = vmul.f32 %v1409_v48, %v1398_v61 }
 0x58e   : > { %v1428_v40 = vmul.f32 0.044715, %v1418_v11 }
 0x58f   : > { %v1429_v3 = vmul.f32 0.044715, %v1419_v35 }
 0x590   : > { %v1438_v8 = vadd.f32 %v1428_v40, %v1396_v24 }
 0x591   : > { %v1439_v10 = vadd.f32 %v1429_v3, %v1398_v61 }
 0x592   : > { %v1448_v43 = vmul.f32 0.7978846, %v1438_v8 }
 0x593   : > { %v1449_v59 = vmul.f32 0.7978846, %v1439_v10 }
 0x594   : > { %2329 = vtanh.f32 %v1448_v43 }
 0x595   : > { %2331 = vtanh.f32 %v1449_v59 }
 0x59e   : > { %v2330_v25 = vpop.eup %2329 }
 0x59f   : > { %v2332_v13 = vpop.eup %2331  ;;  %v1468_v14 = vadd.f32 1.0, %v2330_v25 }
 0x5a0   : > { %v1469_v49 = vadd.f32 1.0, %v2332_v13 }
 0x5a1   : > { %v1478_v15 = vmul.f32 0.5, %v1468_v14 }
 0x5a2   : > { %v1479_v51 = vmul.f32 0.5, %v1469_v49 }
 0x5a3   : > { %v1488_v18 = vmul.f32 %v1478_v15, %v1396_v24 }
 0x5a4   : > { %v1489_v56 = vmul.f32 %v1479_v51, %v1398_v61 }
 0x5a6   : > { %1615 = vmatprep.mubr.f32.mxu1 %v1489_v56 }
 0x5a7   : > { %1616 = vmatmul.mubr.f32.gmra.mrb[28].mxu1 %v1488_v18 }
 0x5d4   : > { %v1992_v54 = vpop.f32.mrb[20].mxu1 }
 0x5d5   : > { %v1993_v21 = vpop.f32.mrb[21].mxu1 }
 0x5d6   : > { %v1994_v22 = vadd.f32 %v1993_v21, %v1992_v54 }
 0x5d8   : > { %v1598_v60 = vadd.f32 %v1994_v22, %v1856_v19  ;;  %v1995_v2 = vpop.f32.mrb[22].mxu1 }
 0x5d9   : > { %v1996_v31 = vpop.f32.mrb[23].mxu1 }
 0x5da   : > { %v1621_v23 = vadd.f32 %v1598_v60, %v2920_v0  ;;  %v1997_v62 = vadd.f32 %v1996_v31, %v1995_v2 }
 0x5dc   : > { %1656 = vst [vmem:[%s3025_s23] sm:$0xff] %v1621_v23  ;;  %v1603_v27 = vadd.f32 %v1997_v62, %v1856_v19  ;;  %v1998_v28 = vpop.f32.mrb[24].mxu1 }
 0x5dd   : > { %v1999_v6 = vpop.f32.mrb[25].mxu1 }
 0x5de   : > { %v1622_v32 = vadd.f32 %v1603_v27, %v2926_v12  ;;  %v2000_v1 = vadd.f32 %v1999_v6, %v1998_v28 }
 0x5e0   : > { %1657 = vst [vmem:[%s3025_s23 + $0x8] sm:$0xff] %v1622_v32  ;;  %v1608_v36 = vadd.f32 %v2000_v1, %v1856_v19  ;;  %v2001_v37 = vpop.f32.mrb[26].mxu1 }
 0x5e1   : > { %v2002_v39 = vpop.f32.mrb[27].mxu1 }
 0x5e2   : > { %v1623_v42 = vadd.f32 %v1608_v36, %v2932_v16  ;;  %v2003_v4 = vadd.f32 %v2002_v39, %v2001_v37 }
 0x5e4   : > { %1658 = vst [vmem:[%s3025_s23 + $0x10] sm:$0xff] %v1623_v42  ;;  %v1613_v44 = vadd.f32 %v2003_v4, %v1856_v19 }
 0x5e6   : > { %v1624_v0 = vadd.f32 %v1613_v44, %v2938_v45 }
 0x5e8   : > { %1659 = vst [vmem:[%s3025_s23 + $0x18] sm:$0xff] %v1624_v0 }
 0x67a   : > { %v2004_v46 = vpop.f32.mrb[28].mxu1 }
 0x67b   : > { %v2005_v47 = vpop.f32.mrb[29].mxu1 }
 0x67c   : > { %v2006_v5 = vadd.f32 %v2005_v47, %v2004_v46 }
 0x67e   : > { %v1618_v12 = vadd.f32 %v2006_v5, %v1856_v19 }
 0x680   : > { %v1625_v17 = vadd.f32 %v1618_v12, %v2944_v38  ;;  %v1639_v50 = vrot.slane %v1618_v12, %v2828_v53 }
 0x682   : > { %1630 = vst [vmem:[#allocation2 + $0x20] sm:$0xff] %v1625_v17  ;;  %v1640_v52 = vcombine.high %v1639_v50, %v1639_v50 }
 0x684   : > { %v1647_v16 = vrot.slane %v1640_v52, %v2828_v53  ;;  %v2333_v53 = vld [vmem:[%s2705_s29] sm:$0xff] }
 0x686   : > { %v1649_v45 = vadd.f32 %v1647_v16, %v1631_v20 }
 0x688   : > { %1650 = vst [vmem:[#allocation3] sm:$0x1] %v1649_v45 }
 0x689   : > { %v1655_v9 = vld [vmem:[#allocation2 + $0x20] sm:$0x1] }
 0x68a   : > { %1660 = vst [vmem:[%s3025_s23 + $0x20] sm:$0x1] %v1655_v9 }
 0x68f   : > { %v1857_v38 = vld [vmem:[#allocation3] ss:$0 sm:$0xff] }
 0x690   : > { %v1672_v55 = vadd.f32 %v2333_v53, %v1857_v38  ;;  %v1673_v57 = vadd.f32 %v2334_v30, %v1857_v38  ;;  %v1674_v58 = vadd.f32 %v2335_v7, %v1857_v38  ;;  %v1675_v63 = vadd.f32 %v2336_v34, %v1857_v38 }
 0x692   : > { %1676 = vst [vmem:[%s366_s22] sm:$0xff] %v1672_v55  ;;  %1677 = vst [vmem:[%s366_s22 + $0x8] sm:$0xff] %v1673_v57 }
 0x693   : > { %1678 = vst [vmem:[%s366_s22 + $0x10] sm:$0xff] %v1674_v58  ;;  %1679 = vst [vmem:[%s366_s22 + $0x18] sm:$0xff] %v1675_v63 }
 0x694   : > { %2406 = shalt.err (!%p2403_p11)
}
 0x695   : > { %s2407_s29 = scalar_lea.hbm %s3044_s12, 512  ;;  %s2411_s17 = scalar_lea.hbm %s3101_s8, 1024 }
 0x696   : > { %p2408_p13 = scmp.ne.s32.totalorder %s3044_s12, %s2407_s29  ;;  %p2412_p6 = scmp.lt.u32.totalorder %s3044_s12, %s3101_s8 }
 0x697   : > { %p2413_p9 = scmp.lt.u32.totalorder %s2411_s17, %s2407_s29  ;;  %p2415_p10 = scmp.lt.u32.totalorder %s2407_s29, %s3044_s12 }
 0x698   : > { %p2409_p0 = pnand %p2408_p13, %p3117_p1 }
 0x699   : > { %p2414_p12 = por %p2413_p9, %p2412_p6 }
 0x69a   : > { %p2410_p5 = pneg %p2409_p0 }
 0x69b   : > { %p2416_p2 = por %p2415_p10, %p2414_p12 }
 0x69d   : > { %p2417_p3 = pnand %p2416_p2, %p2410_p5 }
 0x69f   : > { %2420 = shalt.err (!%p2417_p3)
}
 0x6a0   : > { %s2475_s22 = smov 128   ;;  %s2476_s25 = smov 8  }
 0x6a1   : > { %2208 = dma.vmem_to_hbm [thread:$0]  (%p3117_p1), %s3046_s24, 512, %s3044_s12, %s3052_s9, %s2475_s22, %s2475_s22, %s2476_s25  }
 0x6a2 PF: > { %p2225_p4 = scmp.ge.s32.totalorder %s2463_s30, 2  ;;  %s1725_s10 = sand.u32 1, %s2451_s27  }
 0x6a3   : > { %p3118_p7 = scmp.ne.s32.totalorder %s3109_s16, 0  ;;  %s1726_s13 = scalar_lea.sflag [#allocation6], %s1725_s10 }
 0x6a5   : > { %p2218_p8 = pnand %p2225_p4, %p3118_p7 }
 0x6a7   : > { %2446 = dma.done.wait (!%p2218_p8), %s1726_s13, 512  }
 0x6a8   : > { %2448 = vsyncadd (!%p2218_p8), %s1726_s13, 4294966784  ;;  %s3119_s18 = sld [smem:[#allocation13_spill]]  ;;  %s3120_s29 = sld [smem:[#allocation14_spill]] }
 0x6a9   : > { %p21_p11 = scmp.ge.s32.totalorder %s2547_s11, 4   ;;  %s3121_s27 = smov %s2455_s28 }
 0x6aa   : > { %s3123_s30 = smov %s2547_s11 }
 0x6ab   :  { %23 = sbr.rel (!%p21_p11) target bundleno = 5 (0x5), region = 118 }
 0x6ae   : > { %s3122_s28 = smov %s3119_s18 }
 0x6b2   :  { %1731 = vsyncpa [#allocation5], 1 }
 0x6b3   :  { %1733 = vsyncpa [#allocation5 + $0x1], 1 }
 0x6b4   :  { %1734 = vsyncpa [#allocation8], 1 }
 0x6b5   :  { %1735 = vsyncpa [#allocation6], 1 }
 0x6b6   :  { %1737 = vsyncpa [#allocation6 + $0x1], 1 }

</bundles_post_ra>
